<compile_context>
chip_gen: v7x
topology: tpu7x:2x2x1
jax: 0.10.0
libtpu: 0.0.40
codegen_flags: <defaults>
</compile_context>

<pallas_src>
import math
import functools

import jax
import jax.numpy as jnp
from jax.experimental import pallas as pl
from jax.experimental.pallas import tpu as pltpu

NEG_INF = -1e9


def _round_up(x, m):
    return (x + m - 1) // m * m


# ----------------------------------------------------------------------------
# Tiled linear: out = x @ w + b, optional fused ReLU (K-accumulated in VMEM)
# ----------------------------------------------------------------------------
def _matmul_kernel(x_ref, w_ref, b_ref, o_ref, acc_ref, *, activation):
    @pl.when(pl.program_id(2) == 0)
    def _():
        acc_ref[...] = jnp.zeros_like(acc_ref)

    acc_ref[...] += jnp.dot(x_ref[...], w_ref[...],
                            preferred_element_type=jnp.float32)

    @pl.when(pl.program_id(2) == pl.num_programs(2) - 1)
    def _():
        acc = acc_ref[...] + b_ref[...]
        if activation == "relu":
            acc = jnp.maximum(acc, 0.0)
        o_ref[...] = acc.astype(o_ref.dtype)


def pallas_linear(x, w, b, activation=None, *, tile_m=256, tile_n=256, tile_k=256):
    """x: (M, K) @ w: (K, N) + b: (N,) with optional fused ReLU (applied at finalize)."""
    M, K = x.shape
    N = w.shape[1]
    # 256-class tiles are safe on v5e/v6e (128 MiB VMEM) and v7x (64 MiB VMEM).
    tm = min(tile_m, _round_up(M, 8))
    tk = min(tile_k, _round_up(K, 128))
    tn = min(tile_n, _round_up(N, 128))
    Mp, Kp, Np = _round_up(M, tm), _round_up(K, tk), _round_up(N, tn)

    if (Mp, Kp) != (M, K):
        x = jnp.pad(x, ((0, Mp - M), (0, Kp - K)))
    if (Kp, Np) != (K, N):
        w = jnp.pad(w, ((0, Kp - K), (0, Np - N)))
    b2 = (b if Np == N else jnp.pad(b, (0, Np - N))).reshape(1, Np)

    grid = (Mp // tm, Np // tn, Kp // tk)
    kernel = functools.partial(_matmul_kernel, activation=activation)
    out = pl.pallas_call(
        kernel,
        out_shape=jax.ShapeDtypeStruct((Mp, Np), x.dtype),
        grid_spec=pltpu.PrefetchScalarGridSpec(
            num_scalar_prefetch=0,
            grid=grid,
            in_specs=[
                pl.BlockSpec((tm, tk), lambda i, j, k: (i, k)),
                pl.BlockSpec((tk, tn), lambda i, j, k: (k, j)),
                pl.BlockSpec((1, tn), lambda i, j, k: (0, j)),
            ],
            out_specs=pl.BlockSpec((tm, tn), lambda i, j, k: (i, j)),
            scratch_shapes=[pltpu.VMEM((tm, tn), jnp.float32)],
        ),
        compiler_params=pltpu.CompilerParams(
            dimension_semantics=("parallel", "parallel", "arbitrary"),
            vmem_limit_bytes=32 * 1024 * 1024,
        ),
    )(x, w, b2)
    if (Mp, Np) != (M, N):
        out = out[:M, :N]
    return out


# ----------------------------------------------------------------------------
# Multi-head attention kernel: all heads of one batch element per grid step,
# mask/causal bias built in-kernel, lane-dense (Lq, D) output.
# ----------------------------------------------------------------------------
def _attn_kernel(q_ref, k_ref, v_ref, mask_ref, o_ref, *, nhead, scale, causal):
    q = q_ref[0]                 # (Lq, D)
    k = k_ref[0]                 # (Lk, D)
    v = v_ref[0]                 # (Lk, D)
    key_mask = mask_ref[0]       # (1, Lk), 1 = valid

    Lq, D = q.shape
    Lk = k.shape[0]
    dh = D // nhead

    bias = jnp.where(key_mask > 0, 0.0, NEG_INF)                     # (1, Lk)
    if causal:
        rows = jax.lax.broadcasted_iota(jnp.int32, (Lq, Lk), 0)
        cols = jax.lax.broadcasted_iota(jnp.int32, (Lq, Lk), 1)
        bias = bias + jnp.where(rows >= cols, 0.0, NEG_INF)          # (Lq, Lk)

    dn = (((1,), (1,)), ((), ()))          # contract Dh axes: q @ k^T
    outs = []
    for h in range(nhead):                 # static unroll over heads
        lo, hi = h * dh, (h + 1) * dh
        qh, kh, vh = q[:, lo:hi], k[:, lo:hi], v[:, lo:hi]
        s = jax.lax.dot_general(qh, kh, dn,
                                preferred_element_type=jnp.float32) * scale + bias
        m = jnp.max(s, axis=-1, keepdims=True)
        p = jnp.exp(s - m)
        l = jnp.sum(p, axis=-1, keepdims=True)
        p = p * pl.reciprocal(l, approx=True)
        outs.append(jnp.dot(p.astype(vh.dtype), vh,
                            preferred_element_type=jnp.float32))
    o_ref[0] = jnp.concatenate(outs, axis=-1).astype(o_ref.dtype)


def pallas_attention(q, k, v, key_mask, *, nhead, causal):
    """q: (B, Lq, D), k/v: (B, Lk, D), key_mask: (B, Lk) 1=valid -> (B, Lq, D)."""
    B, Lq, D = q.shape
    Lk = k.shape[1]
    mask3 = key_mask.astype(jnp.float32).reshape(B, 1, Lk)
    scale = 1.0 / math.sqrt(D // nhead)
    kernel = functools.partial(_attn_kernel, nhead=nhead, scale=scale, causal=causal)
    # TODO(synk): for long sequences add a KV-tile grid axis with online softmax
    # (flash-style) so the (Lq, Lk) score matrix never exceeds VMEM on v7x.
    return pl.pallas_call(
        kernel,
        out_shape=jax.ShapeDtypeStruct((B, Lq, D), q.dtype),
        grid=(B,),
        in_specs=[
            pl.BlockSpec((1, Lq, D), lambda b: (b, 0, 0)),
            pl.BlockSpec((1, Lk, D), lambda b: (b, 0, 0)),
            pl.BlockSpec((1, Lk, D), lambda b: (b, 0, 0)),
            pl.BlockSpec((1, 1, Lk), lambda b: (b, 0, 0)),
        ],
        out_specs=pl.BlockSpec((1, Lq, D), lambda b: (b, 0, 0)),
        compiler_params=pltpu.CompilerParams(dimension_semantics=("parallel",)),
    )(q, k, v, mask3)


# ----------------------------------------------------------------------------
# Fused residual-add + LayerNorm kernel
# ----------------------------------------------------------------------------
def _add_ln_kernel(x_ref, r_ref, g_ref, b_ref, o_ref, *, eps):
    x = x_ref[...].astype(jnp.float32) + r_ref[...].astype(jnp.float32)
    mu = jnp.mean(x, axis=-1, keepdims=True)
    xc = x - mu
    var = jnp.mean(xc * xc, axis=-1, keepdims=True)
    y = xc * jax.lax.rsqrt(var + eps)
    o_ref[...] = (y * g_ref[...] + b_ref[...]).astype(o_ref.dtype)


def pallas_add_layer_norm(x, r, g, b, eps=1e-5):
    """LayerNorm(x + r) over last dim. x, r: (M, D); g, b: (D,)."""
    M, D = x.shape
    tm = min(256, _round_up(M, 8))
    Mp = _round_up(M, tm)
    if Mp != M:
        x = jnp.pad(x, ((0, Mp - M), (0, 0)))
        r = jnp.pad(r, ((0, Mp - M), (0, 0)))
    out = pl.pallas_call(
        functools.partial(_add_ln_kernel, eps=eps),
        out_shape=jax.ShapeDtypeStruct((Mp, D), x.dtype),
        grid=(Mp // tm,),
        in_specs=[
            pl.BlockSpec((tm, D), lambda i: (i, 0)),
            pl.BlockSpec((tm, D), lambda i: (i, 0)),
            pl.BlockSpec((1, D), lambda i: (0, 0)),
            pl.BlockSpec((1, D), lambda i: (0, 0)),
        ],
        out_specs=pl.BlockSpec((tm, D), lambda i: (i, 0)),
        compiler_params=pltpu.CompilerParams(dimension_semantics=("parallel",)),
    )(x, r, g.reshape(1, D), b.reshape(1, D))
    return out[:M] if Mp != M else out


# ----------------------------------------------------------------------------
# Model glue (plain JAX for embeddings / reshapes only)
# ----------------------------------------------------------------------------
def sinusoid_pos(L, D):
    pos = jnp.arange(L, dtype=jnp.float32)[:, None]
    i = jnp.arange(0, D, 2, dtype=jnp.float32)
    angle = pos / jnp.power(10000.0, i / D)
    pe = jnp.zeros((L, D), jnp.float32)
    pe = pe.at[:, 0::2].set(jnp.sin(angle))
    pe = pe.at[:, 1::2].set(jnp.cos(angle))
    return pe


def add_ln(x, r, p):
    B, L, D = x.shape
    y = pallas_add_layer_norm(x.reshape(B * L, D), r.reshape(B * L, D), p["g"], p["b"])
    return y.reshape(B, L, D)


def self_attention(p, x, key_mask, nhead, causal):
    B, L, D = x.shape
    qkv = pallas_linear(x.reshape(B * L, D), p["qkv"]["w"], p["qkv"]["b"])
    qkv = qkv.reshape(B, L, 3 * D)
    q, k, v = qkv[..., :D], qkv[..., D:2 * D], qkv[..., 2 * D:]
    o = pallas_attention(q, k, v, key_mask, nhead=nhead, causal=causal)
    return pallas_linear(o.reshape(B * L, D), p["o"]["w"], p["o"]["b"]).reshape(B, L, D)


def cross_attention(p, y, memory, key_mask, nhead):
    B, Lq, D = y.shape
    Lk = memory.shape[1]
    q = pallas_linear(y.reshape(B * Lq, D), p["q"]["w"], p["q"]["b"]).reshape(B, Lq, D)
    kv = pallas_linear(memory.reshape(B * Lk, D), p["kv"]["w"], p["kv"]["b"])
    kv = kv.reshape(B, Lk, 2 * D)
    k, v = kv[..., :D], kv[..., D:]
    o = pallas_attention(q, k, v, key_mask, nhead=nhead, causal=False)
    return pallas_linear(o.reshape(B * Lq, D), p["o"]["w"], p["o"]["b"]).reshape(B, Lq, D)


def feed_forward(p, x):
    B, L, D = x.shape
    h = pallas_linear(x.reshape(B * L, D), p["ff1"]["w"], p["ff1"]["b"], activation="relu")
    h = pallas_linear(h, p["ff2"]["w"], p["ff2"]["b"])
    return h.reshape(B, L, D)


def encoder_layer(p, x, src_mask, nhead):
    a = self_attention(p["self"], x, src_mask, nhead, causal=False)
    x = add_ln(x, a, p["ln1"])
    h = feed_forward(p, x)
    x = add_ln(x, h, p["ln2"])
    return x


def decoder_layer(p, y, memory, tgt_mask, src_mask, nhead):
    a = self_attention(p["self"], y, tgt_mask, nhead, causal=True)
    y = add_ln(y, a, p["ln1"])
    c = cross_attention(p["cross"], y, memory, src_mask, nhead)
    y = add_ln(y, c, p["ln2"])
    h = feed_forward(p, y)
    y = add_ln(y, h, p["ln3"])
    return y


def gnn_transformer_forward(params, T, TN, HM, S_, SM, V, *, nhead):
    """Forward of GNN_Transformer with gnn_encoder=None (tns_only path).

    T: (B, Ls) source ids, HM: (B, Ls) source mask (1=valid),
    S_: (B, Lt) target ids, SM: (B, Lt) target mask, TN / V: unused here.
    Returns logits (B, Lt, vocab).
    """
    del TN, V  # unused on the tns_only path
    D = params["embed"].shape[1]
    B, Ls = T.shape
    Lt = S_.shape[1]
    scale = math.sqrt(D)

    # --- Transformer encoder: Encoder(T, HM) ---
    x = jnp.take(params["embed"], T, axis=0) * scale + sinusoid_pos(Ls, D)[None]
    for lp in params["enc_layers"]:
        x = encoder_layer(lp, x, HM, nhead)
    memory = x

    # --- Transformer decoder: Decoder(S_, memory, HM, SM) ---
    y = jnp.take(params["embed"], S_, axis=0) * scale + sinusoid_pos(Lt, D)[None]
    for lp in params["dec_layers"]:
        y = decoder_layer(lp, y, memory, SM, HM, nhead)

    # --- self.out = nn.Linear(d_model, vocab_size) ---
    logits = pallas_linear(y.reshape(B * Lt, D), params["out"]["w"], params["out"]["b"])
    return logits.reshape(B, Lt, -1)


# ----------------------------------------------------------------------------
# Deterministic parameter initialization (QKV / KV weights pre-fused)
# ----------------------------------------------------------------------------
def init_params(key, vocab_size, d_model, nhead, d_ff, n_enc, n_dec):
    keys = iter(jax.random.split(key, 256))

    def nk():
        return next(keys)

    def dense(fan_in, fan_out):
        w = jax.random.normal(nk(), (fan_in, fan_out), jnp.float32) / math.sqrt(fan_in)
        return {"w": w, "b": jnp.zeros((fan_out,), jnp.float32)}

    def ln():
        return {"g": jnp.ones((d_model,), jnp.float32),
                "b": jnp.zeros((d_model,), jnp.float32)}

    def self_attn_block():
        return {"qkv": dense(d_model, 3 * d_model), "o": dense(d_model, d_model)}

    def cross_attn_block():
        return {"q": dense(d_model, d_model), "kv": dense(d_model, 2 * d_model),
                "o": dense(d_model, d_model)}

    def enc_layer():
        return {"self": self_attn_block(), "ln1": ln(),
                "ff1": dense(d_model, d_ff), "ff2": dense(d_ff, d_model), "ln2": ln()}

    def dec_layer():
        return {"self": self_attn_block(), "ln1": ln(),
                "cross": cross_attn_block(), "ln2": ln(),
                "ff1": dense(d_model, d_ff), "ff2": dense(d_ff, d_model), "ln3": ln()}

    return {
        "embed": jax.random.normal(nk(), (vocab_size, d_model), jnp.float32) * 0.02,
        "enc_layers": [enc_layer() for _ in range(n_enc)],
        "dec_layers": [dec_layer() for _ in range(n_dec)],
        "out": dense(d_model, vocab_size),
    }


# ----------------------------------------------------------------------------
if __name__ == "__main__":
    vocab_size, d_model, nhead, d_ff = 50, 32, 4, 64
    n_enc, n_dec = 2, 2
    B, Ls, Lt = 2, 8, 8

    root = jax.random.PRNGKey(0)
    k_params, k_T, k_S = jax.random.split(root, 3)

    params = init_params(k_params, vocab_size, d_model, nhead, d_ff, n_enc, n_dec)

    T = jax.random.randint(k_T, (B, Ls), 0, vocab_size, dtype=jnp.int32)
    S_ = jax.random.randint(k_S, (B, Lt), 0, vocab_size, dtype=jnp.int32)
    TN = jnp.full((B,), Ls, dtype=jnp.int32)                 # token counts (unused here)
    HM = jnp.ones((B, Ls), dtype=jnp.float32)                # source mask (1 = valid)
    SM = jnp.ones((B, Lt), dtype=jnp.float32)                # target mask (1 = valid)
    V = jnp.zeros((B, Ls), dtype=jnp.int32)                  # graph values (unused here)

    fwd = jax.jit(functools.partial(gnn_transformer_forward, nhead=nhead))
    out = fwd(params, T, TN, HM, S_, SM, V)
    out = jax.block_until_ready(out)
    assert out.shape == (B, Lt, vocab_size), out.shape
    assert bool(jnp.all(jnp.isfinite(out)))
    print("KERNEL_OK")
</pallas_src>

<mosaic_0001>
module attributes {stable_mosaic.version = 11 : i64} {
  func.func @_add_ln_kernel(%arg0: i32, %arg1: memref<16x32xf32, #tpu.memory_space<vmem>>, %arg2: memref<16x32xf32, #tpu.memory_space<vmem>>, %arg3: memref<1x32xf32, #tpu.memory_space<vmem>>, %arg4: memref<1x32xf32, #tpu.memory_space<vmem>>, %arg5: memref<16x32xf32, #tpu.memory_space<vmem>>) attributes {dimension_semantics = [#tpu.dimension_semantics<parallel>], iteration_bounds = array<i64: 1>, scalar_prefetch = 0 : i64, scratch_operands = 0 : i64, tpu.core_type = #tpu.core_type<tc>, window_params = [{transform_indices = @transform_0, window_bounds = array<i64: 16, 32>}, {transform_indices = @transform_1, window_bounds = array<i64: 16, 32>}, {pipeline_mode = #tpu.pipeline_mode<synchronous>, transform_indices = @transform_2, window_bounds = array<i64: 1, 32>}, {pipeline_mode = #tpu.pipeline_mode<synchronous>, transform_indices = @transform_3, window_bounds = array<i64: 1, 32>}, {transform_indices = @transform_4, window_bounds = array<i64: 16, 32>}]} {
    %c0 = arith.constant 0 : index
    %c0_0 = arith.constant 0 : index
    %0 = vector.load %arg1[%c0, %c0_0] : memref<16x32xf32, #tpu.memory_space<vmem>>, vector<16x32xf32>
    %c0_1 = arith.constant 0 : index
    %c0_2 = arith.constant 0 : index
    %1 = vector.load %arg2[%c0_1, %c0_2] : memref<16x32xf32, #tpu.memory_space<vmem>>, vector<16x32xf32>
    %2 = arith.addf %0, %1 : vector<16x32xf32>
    %cst = arith.constant dense<0.000000e+00> : vector<16xf32>
    %3 = vector.multi_reduction <add>, %2, %cst [1] : vector<16x32xf32> to vector<16xf32>
    %4 = vector.shape_cast %3 : vector<16xf32> to vector<16x1xf32>
    %cst_3 = arith.constant 3.200000e+01 : f32
    %5 = vector.broadcast %cst_3 : f32 to vector<16x1xf32>
    %6 = arith.divf %4, %5 : vector<16x1xf32>
    %7 = vector.broadcast %6 : vector<16x1xf32> to vector<16x32xf32>
    %8 = arith.subf %2, %7 : vector<16x32xf32>
    %9 = arith.mulf %8, %8 : vector<16x32xf32>
    %cst_4 = arith.constant dense<0.000000e+00> : vector<16xf32>
    %10 = vector.multi_reduction <add>, %9, %cst_4 [1] : vector<16x32xf32> to vector<16xf32>
    %11 = vector.shape_cast %10 : vector<16xf32> to vector<16x1xf32>
    %cst_5 = arith.constant 3.200000e+01 : f32
    %12 = vector.broadcast %cst_5 : f32 to vector<16x1xf32>
    %13 = arith.divf %11, %12 : vector<16x1xf32>
    %cst_6 = arith.constant 9.99999974E-6 : f32
    %14 = vector.broadcast %cst_6 : f32 to vector<16x1xf32>
    %15 = arith.addf %13, %14 : vector<16x1xf32>
    %16 = math.rsqrt %15 : vector<16x1xf32>
    %17 = vector.broadcast %16 : vector<16x1xf32> to vector<16x32xf32>
    %18 = arith.mulf %8, %17 : vector<16x32xf32>
    %c0_7 = arith.constant 0 : index
    %c0_8 = arith.constant 0 : index
    %19 = vector.load %arg3[%c0_7, %c0_8] : memref<1x32xf32, #tpu.memory_space<vmem>>, vector<1x32xf32>
    %20 = vector.broadcast %19 : vector<1x32xf32> to vector<16x32xf32>
    %21 = arith.mulf %18, %20 : vector<16x32xf32>
    %c0_9 = arith.constant 0 : index
    %c0_10 = arith.constant 0 : index
    %22 = vector.load %arg4[%c0_9, %c0_10] : memref<1x32xf32, #tpu.memory_space<vmem>>, vector<1x32xf32>
    %23 = vector.broadcast %22 : vector<1x32xf32> to vector<16x32xf32>
    %24 = arith.addf %21, %23 : vector<16x32xf32>
    %c0_11 = arith.constant 0 : index
    %c0_12 = arith.constant 0 : index
    %25 = vector.load %arg5[%c0_11, %c0_12] : memref<16x32xf32, #tpu.memory_space<vmem>>, vector<16x32xf32>
    tpu.vector_store %arg5[%c0_11, %c0_12], %24 {strides = array<i32>} : memref<16x32xf32, #tpu.memory_space<vmem>>, vector<16x32xf32>,
    return
  }
  func.func @transform_0(%arg0: i32) -> (i32, i32) {
    %c0_i32 = arith.constant 0 : i32
    %c0_i32_0 = arith.constant 0 : i32
    return %arg0, %c0_i32 : i32, i32
  }
  func.func @transform_1(%arg0: i32) -> (i32, i32) {
    %c0_i32 = arith.constant 0 : i32
    %c0_i32_0 = arith.constant 0 : i32
    return %arg0, %c0_i32 : i32, i32
  }
  func.func @transform_2(%arg0: i32) -> (i32, i32) {
    %c0_i32 = arith.constant 0 : i32
    %c0_i32_0 = arith.constant 0 : i32
    %c0_i32_1 = arith.constant 0 : i32
    return %c0_i32, %c0_i32_0 : i32, i32
  }
  func.func @transform_3(%arg0: i32) -> (i32, i32) {
    %c0_i32 = arith.constant 0 : i32
    %c0_i32_0 = arith.constant 0 : i32
    %c0_i32_1 = arith.constant 0 : i32
    return %c0_i32, %c0_i32_0 : i32, i32
  }
  func.func @transform_4(%arg0: i32) -> (i32, i32) {
    %c0_i32 = arith.constant 0 : i32
    %c0_i32_0 = arith.constant 0 : i32
    return %arg0, %c0_i32 : i32, i32
  }
}

module attributes {stable_mosaic.version = 11 : i64} {
  func.func @_matmul_kernel(%arg0: i32, %arg1: i32, %arg2: i32, %arg3: memref<16x128xf32, #tpu.memory_space<vmem>>, %arg4: memref<128x128xf32, #tpu.memory_space<vmem>>, %arg5: memref<1x128xf32, #tpu.memory_space<vmem>>, %arg6: memref<16x128xf32, #tpu.memory_space<vmem>>, %arg7: memref<16x128xf32, #tpu.memory_space<vmem>>) attributes {dimension_semantics = [#tpu.dimension_semantics<parallel>, #tpu.dimension_semantics<parallel>, #tpu.dimension_semantics<arbitrary>], iteration_bounds = array<i64: 1, 1, 1>, scalar_prefetch = 0 : i64, scratch_operands = 1 : i64, tpu.core_type = #tpu.core_type<tc>, window_params = [{transform_indices = @transform_0, window_bounds = array<i64: 16, 128>}, {transform_indices = @transform_1, window_bounds = array<i64: 128, 128>}, {transform_indices = @transform_2, window_bounds = array<i64: 1, 128>}, {transform_indices = @transform_3, window_bounds = array<i64: 16, 128>}]} {
    %c0_i32 = arith.constant 0 : i32
    %0 = arith.cmpi eq, %arg2, %c0_i32 : i32
    %1 = arith.extui %0 : i1 to i32
    %c0_i32_0 = arith.constant 0 : i32
    %2 = arith.cmpi ne, %1, %c0_i32_0 : i32
    scf.if %2 {
      %cst_10 = arith.constant 0.000000e+00 : f32
      %12 = vector.broadcast %cst_10 : f32 to vector<16x128xf32>
      %c0_11 = arith.constant 0 : index
      %c0_12 = arith.constant 0 : index
      %13 = vector.load %arg7[%c0_11, %c0_12] : memref<16x128xf32, #tpu.memory_space<vmem>>, vector<16x128xf32>
      tpu.vector_store %arg7[%c0_11, %c0_12], %12 {strides = array<i32>} : memref<16x128xf32, #tpu.memory_space<vmem>>, vector<16x128xf32>,
    } else {
    }
    %c0 = arith.constant 0 : index
    %c0_1 = arith.constant 0 : index
    %3 = vector.load %arg7[%c0, %c0_1] : memref<16x128xf32, #tpu.memory_space<vmem>>, vector<16x128xf32>
    %c0_2 = arith.constant 0 : index
    %c0_3 = arith.constant 0 : index
    %4 = vector.load %arg3[%c0_2, %c0_3] : memref<16x128xf32, #tpu.memory_space<vmem>>, vector<16x128xf32>
    %c0_4 = arith.constant 0 : index
    %c0_5 = arith.constant 0 : index
    %5 = vector.load %arg4[%c0_4, %c0_5] : memref<128x128xf32, #tpu.memory_space<vmem>>, vector<128x128xf32>
    %cst = arith.constant dense<0.000000e+00> : vector<16x128xf32>
    %6 = tpu.matmul %4, %5, %cst {dimension_numbers = #tpu.dot_dimension_numbers<[1], [0], [0], [1], [0, 0, 1, 1], [], []>} : vector<16x128xf32>, vector<128x128xf32>, vector<16x128xf32> -> vector<16x128xf32>
    %7 = arith.addf %3, %6 : vector<16x128xf32>
    %c0_6 = arith.constant 0 : index
    %c0_7 = arith.constant 0 : index
    %8 = vector.load %arg7[%c0_6, %c0_7] : memref<16x128xf32, #tpu.memory_space<vmem>>, vector<16x128xf32>
    tpu.vector_store %arg7[%c0_6, %c0_7], %7 {strides = array<i32>} : memref<16x128xf32, #tpu.memory_space<vmem>>, vector<16x128xf32>,
    %c0_i32_8 = arith.constant 0 : i32
    %9 = arith.cmpi eq, %arg2, %c0_i32_8 : i32
    %10 = arith.extui %9 : i1 to i32
    %c0_i32_9 = arith.constant 0 : i32
    %11 = arith.cmpi ne, %10, %c0_i32_9 : i32
    scf.if %11 {
      %c0_10 = arith.constant 0 : index
      %c0_11 = arith.constant 0 : index
      %12 = vector.load %arg7[%c0_10, %c0_11] : memref<16x128xf32, #tpu.memory_space<vmem>>, vector<16x128xf32>
      %c0_12 = arith.constant 0 : index
      %c0_13 = arith.constant 0 : index
      %13 = vector.load %arg5[%c0_12, %c0_13] : memref<1x128xf32, #tpu.memory_space<vmem>>, vector<1x128xf32>
      %14 = vector.broadcast %13 : vector<1x128xf32> to vector<16x128xf32>
      %15 = arith.addf %12, %14 : vector<16x128xf32>
      %c0_14 = arith.constant 0 : index
      %c0_15 = arith.constant 0 : index
      %16 = vector.load %arg6[%c0_14, %c0_15] : memref<16x128xf32, #tpu.memory_space<vmem>>, vector<16x128xf32>
      tpu.vector_store %arg6[%c0_14, %c0_15], %15 {strides = array<i32>} : memref<16x128xf32, #tpu.memory_space<vmem>>, vector<16x128xf32>,
    } else {
    }
    return
  }
  func.func @transform_0(%arg0: i32, %arg1: i32, %arg2: i32) -> (i32, i32) {
    %c0_i32 = arith.constant 0 : i32
    return %arg0, %arg2 : i32, i32
  }
  func.func @transform_1(%arg0: i32, %arg1: i32, %arg2: i32) -> (i32, i32) {
    %c0_i32 = arith.constant 0 : i32
    return %arg2, %arg1 : i32, i32
  }
  func.func @transform_2(%arg0: i32, %arg1: i32, %arg2: i32) -> (i32, i32) {
    %c0_i32 = arith.constant 0 : i32
    %c0_i32_0 = arith.constant 0 : i32
    return %c0_i32, %arg1 : i32, i32
  }
  func.func @transform_3(%arg0: i32, %arg1: i32, %arg2: i32) -> (i32, i32) {
    %c0_i32 = arith.constant 0 : i32
    return %arg0, %arg1 : i32, i32
  }
}

module attributes {stable_mosaic.version = 11 : i64} {
  func.func @_attn_kernel(%arg0: i32, %arg1: memref<1x8x32xf32, #tpu.memory_space<vmem>>, %arg2: memref<1x8x32xf32, #tpu.memory_space<vmem>>, %arg3: memref<1x8x32xf32, #tpu.memory_space<vmem>>, %arg4: memref<1x1x8xf32, #tpu.memory_space<vmem>>, %arg5: memref<1x8x32xf32, #tpu.memory_space<vmem>>) attributes {dimension_semantics = [#tpu.dimension_semantics<parallel>], iteration_bounds = array<i64: 2>, scalar_prefetch = 0 : i64, scratch_operands = 0 : i64, tpu.core_type = #tpu.core_type<tc>, window_params = [{transform_indices = @transform_0, window_bounds = array<i64: 1, 8, 32>}, {transform_indices = @transform_1, window_bounds = array<i64: 1, 8, 32>}, {transform_indices = @transform_2, window_bounds = array<i64: 1, 8, 32>}, {transform_indices = @transform_3, window_bounds = array<i64: 1, 1, 8>}, {transform_indices = @transform_4, window_bounds = array<i64: 1, 8, 32>}]} {
    %c0 = arith.constant 0 : index
    %c0_0 = arith.constant 0 : index
    %c0_1 = arith.constant 0 : index
    %0 = vector.load %arg1[%c0, %c0_0, %c0_1] : memref<1x8x32xf32, #tpu.memory_space<vmem>>, vector<1x8x32xf32>
    %1 = vector.shape_cast %0 : vector<1x8x32xf32> to vector<8x32xf32>
    %c0_2 = arith.constant 0 : index
    %c0_3 = arith.constant 0 : index
    %c0_4 = arith.constant 0 : index
    %2 = vector.load %arg2[%c0_2, %c0_3, %c0_4] : memref<1x8x32xf32, #tpu.memory_space<vmem>>, vector<1x8x32xf32>
    %3 = vector.shape_cast %2 : vector<1x8x32xf32> to vector<8x32xf32>
    %c0_5 = arith.constant 0 : index
    %c0_6 = arith.constant 0 : index
    %c0_7 = arith.constant 0 : index
    %4 = vector.load %arg3[%c0_5, %c0_6, %c0_7] : memref<1x8x32xf32, #tpu.memory_space<vmem>>, vector<1x8x32xf32>
    %5 = vector.shape_cast %4 : vector<1x8x32xf32> to vector<8x32xf32>
    %c0_8 = arith.constant 0 : index
    %c0_9 = arith.constant 0 : index
    %c0_10 = arith.constant 0 : index
    %6 = vector.load %arg4[%c0_8, %c0_9, %c0_10] : memref<1x1x8xf32, #tpu.memory_space<vmem>>, vector<1x1x8xf32>
    %7 = vector.shape_cast %6 : vector<1x1x8xf32> to vector<1x8xf32>
    %cst = arith.constant 0.000000e+00 : f32
    %8 = vector.broadcast %cst : f32 to vector<1x8xf32>
    %9 = arith.cmpf ogt, %7, %8 : vector<1x8xf32>
    %cst_11 = arith.constant 0.000000e+00 : f32
    %cst_12 = arith.constant -1.000000e+09 : f32
    %10 = vector.broadcast %cst_11 : f32 to vector<1x8xf32>
    %11 = vector.broadcast %cst_12 : f32 to vector<1x8xf32>
    %12 = arith.select %9, %10, %11 : vector<1x8xi1>, vector<1x8xf32>
    %13 = vector.extract_strided_slice %1 {offsets = [0, 0], sizes = [8, 8], strides = [1, 1]} : vector<8x32xf32> to vector<8x8xf32>
    %14 = vector.extract_strided_slice %3 {offsets = [0, 0], sizes = [8, 8], strides = [1, 1]} : vector<8x32xf32> to vector<8x8xf32>
    %15 = vector.extract_strided_slice %5 {offsets = [0, 0], sizes = [8, 8], strides = [1, 1]} : vector<8x32xf32> to vector<8x8xf32>
    %cst_13 = arith.constant dense<0.000000e+00> : vector<8x8xf32>
    %16 = tpu.matmul %13, %14, %cst_13 {dimension_numbers = #tpu.dot_dimension_numbers<[1], [1], [0], [0], [0, 0, 1, 0], [], []>} : vector<8x8xf32>, vector<8x8xf32>, vector<8x8xf32> -> vector<8x8xf32>
    %cst_14 = arith.constant 0.353553385 : f32
    %17 = vector.broadcast %cst_14 : f32 to vector<8x8xf32>
    %18 = arith.mulf %16, %17 : vector<8x8xf32>
    %19 = vector.broadcast %12 : vector<1x8xf32> to vector<8x8xf32>
    %20 = arith.addf %18, %19 : vector<8x8xf32>
    %cst_15 = arith.constant dense<0xFF800000> : vector<8xf32>
    %21 = vector.multi_reduction <maximumf>, %20, %cst_15 [1] : vector<8x8xf32> to vector<8xf32>
    %22 = vector.shape_cast %21 : vector<8xf32> to vector<8x1xf32>
    %23 = vector.broadcast %22 : vector<8x1xf32> to vector<8x8xf32>
    %24 = arith.subf %20, %23 : vector<8x8xf32>
    %25 = math.exp %24 : vector<8x8xf32>
    %cst_16 = arith.constant dense<0.000000e+00> : vector<8xf32>
    %26 = vector.multi_reduction <add>, %25, %cst_16 [1] : vector<8x8xf32> to vector<8xf32>
    %27 = vector.shape_cast %26 : vector<8xf32> to vector<8x1xf32>
    %28 = tpu.reciprocal %27 {approx = true} : vector<8x1xf32> -> vector<8x1xf32>
    %29 = vector.broadcast %28 : vector<8x1xf32> to vector<8x8xf32>
    %30 = arith.mulf %25, %29 : vector<8x8xf32>
    %cst_17 = arith.constant dense<0.000000e+00> : vector<8x8xf32>
    %31 = tpu.matmul %30, %15, %cst_17 {dimension_numbers = #tpu.dot_dimension_numbers<[1], [0], [0], [1], [0, 0, 1, 1], [], []>} : vector<8x8xf32>, vector<8x8xf32>, vector<8x8xf32> -> vector<8x8xf32>
    %32 = vector.extract_strided_slice %1 {offsets = [0, 8], sizes = [8, 8], strides = [1, 1]} : vector<8x32xf32> to vector<8x8xf32>
    %33 = vector.extract_strided_slice %3 {offsets = [0, 8], sizes = [8, 8], strides = [1, 1]} : vector<8x32xf32> to vector<8x8xf32>
    %34 = vector.extract_strided_slice %5 {offsets = [0, 8], sizes = [8, 8], strides = [1, 1]} : vector<8x32xf32> to vector<8x8xf32>
    %cst_18 = arith.constant dense<0.000000e+00> : vector<8x8xf32>
    %35 = tpu.matmul %32, %33, %cst_18 {dimension_numbers = #tpu.dot_dimension_numbers<[1], [1], [0], [0], [0, 0, 1, 0], [], []>} : vector<8x8xf32>, vector<8x8xf32>, vector<8x8xf32> -> vector<8x8xf32>
    %cst_19 = arith.constant 0.353553385 : f32
    %36 = vector.broadcast %cst_19 : f32 to vector<8x8xf32>
    %37 = arith.mulf %35, %36 : vector<8x8xf32>
    %38 = vector.broadcast %12 : vector<1x8xf32> to vector<8x8xf32>
    %39 = arith.addf %37, %38 : vector<8x8xf32>
    %cst_20 = arith.constant dense<0xFF800000> : vector<8xf32>
    %40 = vector.multi_reduction <maximumf>, %39, %cst_20 [1] : vector<8x8xf32> to vector<8xf32>
    %41 = vector.shape_cast %40 : vector<8xf32> to vector<8x1xf32>
    %42 = vector.broadcast %41 : vector<8x1xf32> to vector<8x8xf32>
    %43 = arith.subf %39, %42 : vector<8x8xf32>
    %44 = math.exp %43 : vector<8x8xf32>
    %cst_21 = arith.constant dense<0.000000e+00> : vector<8xf32>
    %45 = vector.multi_reduction <add>, %44, %cst_21 [1] : vector<8x8xf32> to vector<8xf32>
    %46 = vector.shape_cast %45 : vector<8xf32> to vector<8x1xf32>
    %47 = tpu.reciprocal %46 {approx = true} : vector<8x1xf32> -> vector<8x1xf32>
    %48 = vector.broadcast %47 : vector<8x1xf32> to vector<8x8xf32>
    %49 = arith.mulf %44, %48 : vector<8x8xf32>
    %cst_22 = arith.constant dense<0.000000e+00> : vector<8x8xf32>
    %50 = tpu.matmul %49, %34, %cst_22 {dimension_numbers = #tpu.dot_dimension_numbers<[1], [0], [0], [1], [0, 0, 1, 1], [], []>} : vector<8x8xf32>, vector<8x8xf32>, vector<8x8xf32> -> vector<8x8xf32>
    %51 = vector.extract_strided_slice %1 {offsets = [0, 16], sizes = [8, 8], strides = [1, 1]} : vector<8x32xf32> to vector<8x8xf32>
    %52 = vector.extract_strided_slice %3 {offsets = [0, 16], sizes = [8, 8], strides = [1, 1]} : vector<8x32xf32> to vector<8x8xf32>
    %53 = vector.extract_strided_slice %5 {offsets = [0, 16], sizes = [8, 8], strides = [1, 1]} : vector<8x32xf32> to vector<8x8xf32>
    %cst_23 = arith.constant dense<0.000000e+00> : vector<8x8xf32>
    %54 = tpu.matmul %51, %52, %cst_23 {dimension_numbers = #tpu.dot_dimension_numbers<[1], [1], [0], [0], [0, 0, 1, 0], [], []>} : vector<8x8xf32>, vector<8x8xf32>, vector<8x8xf32> -> vector<8x8xf32>
    %cst_24 = arith.constant 0.353553385 : f32
    %55 = vector.broadcast %cst_24 : f32 to vector<8x8xf32>
    %56 = arith.mulf %54, %55 : vector<8x8xf32>
    %57 = vector.broadcast %12 : vector<1x8xf32> to vector<8x8xf32>
    %58 = arith.addf %56, %57 : vector<8x8xf32>
    %cst_25 = arith.constant dense<0xFF800000> : vector<8xf32>
    %59 = vector.multi_reduction <maximumf>, %58, %cst_25 [1] : vector<8x8xf32> to vector<8xf32>
    %60 = vector.shape_cast %59 : vector<8xf32> to vector<8x1xf32>
    %61 = vector.broadcast %60 : vector<8x1xf32> to vector<8x8xf32>
    %62 = arith.subf %58, %61 : vector<8x8xf32>
    %63 = math.exp %62 : vector<8x8xf32>
    %cst_26 = arith.constant dense<0.000000e+00> : vector<8xf32>
    %64 = vector.multi_reduction <add>, %63, %cst_26 [1] : vector<8x8xf32> to vector<8xf32>
    %65 = vector.shape_cast %64 : vector<8xf32> to vector<8x1xf32>
    %66 = tpu.reciprocal %65 {approx = true} : vector<8x1xf32> -> vector<8x1xf32>
    %67 = vector.broadcast %66 : vector<8x1xf32> to vector<8x8xf32>
    %68 = arith.mulf %63, %67 : vector<8x8xf32>
    %cst_27 = arith.constant dense<0.000000e+00> : vector<8x8xf32>
    %69 = tpu.matmul %68, %53, %cst_27 {dimension_numbers = #tpu.dot_dimension_numbers<[1], [0], [0], [1], [0, 0, 1, 1], [], []>} : vector<8x8xf32>, vector<8x8xf32>, vector<8x8xf32> -> vector<8x8xf32>
    %70 = vector.extract_strided_slice %1 {offsets = [0, 24], sizes = [8, 8], strides = [1, 1]} : vector<8x32xf32> to vector<8x8xf32>
    %71 = vector.extract_strided_slice %3 {offsets = [0, 24], sizes = [8, 8], strides = [1, 1]} : vector<8x32xf32> to vector<8x8xf32>
    %72 = vector.extract_strided_slice %5 {offsets = [0, 24], sizes = [8, 8], strides = [1, 1]} : vector<8x32xf32> to vector<8x8xf32>
    %cst_28 = arith.constant dense<0.000000e+00> : vector<8x8xf32>
    %73 = tpu.matmul %70, %71, %cst_28 {dimension_numbers = #tpu.dot_dimension_numbers<[1], [1], [0], [0], [0, 0, 1, 0], [], []>} : vector<8x8xf32>, vector<8x8xf32>, vector<8x8xf32> -> vector<8x8xf32>
    %cst_29 = arith.constant 0.353553385 : f32
    %74 = vector.broadcast %cst_29 : f32 to vector<8x8xf32>
    %75 = arith.mulf %73, %74 : vector<8x8xf32>
    %76 = vector.broadcast %12 : vector<1x8xf32> to vector<8x8xf32>
    %77 = arith.addf %75, %76 : vector<8x8xf32>
    %cst_30 = arith.constant dense<0xFF800000> : vector<8xf32>
    %78 = vector.multi_reduction <maximumf>, %77, %cst_30 [1] : vector<8x8xf32> to vector<8xf32>
    %79 = vector.shape_cast %78 : vector<8xf32> to vector<8x1xf32>
    %80 = vector.broadcast %79 : vector<8x1xf32> to vector<8x8xf32>
    %81 = arith.subf %77, %80 : vector<8x8xf32>
    %82 = math.exp %81 : vector<8x8xf32>
    %cst_31 = arith.constant dense<0.000000e+00> : vector<8xf32>
    %83 = vector.multi_reduction <add>, %82, %cst_31 [1] : vector<8x8xf32> to vector<8xf32>
    %84 = vector.shape_cast %83 : vector<8xf32> to vector<8x1xf32>
    %85 = tpu.reciprocal %84 {approx = true} : vector<8x1xf32> -> vector<8x1xf32>
    %86 = vector.broadcast %85 : vector<8x1xf32> to vector<8x8xf32>
    %87 = arith.mulf %82, %86 : vector<8x8xf32>
    %cst_32 = arith.constant dense<0.000000e+00> : vector<8x8xf32>
    %88 = tpu.matmul %87, %72, %cst_32 {dimension_numbers = #tpu.dot_dimension_numbers<[1], [0], [0], [1], [0, 0, 1, 1], [], []>} : vector<8x8xf32>, vector<8x8xf32>, vector<8x8xf32> -> vector<8x8xf32>
    %89 = tpu.concatenate %31, %50, %69, %88 in 1 : vector<8x8xf32>, vector<8x8xf32>, vector<8x8xf32>, vector<8x8xf32> -> vector<8x32xf32>
    %c0_33 = arith.constant 0 : index
    %c0_34 = arith.constant 0 : index
    %c0_35 = arith.constant 0 : index
    %90 = vector.load %arg5[%c0_33, %c0_34, %c0_35] : memref<1x8x32xf32, #tpu.memory_space<vmem>>, vector<1x8x32xf32>
    %91 = vector.shape_cast %90 : vector<1x8x32xf32> to vector<8x32xf32>
    %92 = vector.shape_cast %89 : vector<8x32xf32> to vector<1x8x32xf32>
    tpu.vector_store %arg5[%c0_33, %c0_34, %c0_35], %92 {strides = array<i32>} : memref<1x8x32xf32, #tpu.memory_space<vmem>>, vector<1x8x32xf32>,
    return
  }
  func.func @transform_0(%arg0: i32) -> (i32, i32, i32) {
    %c0_i32 = arith.constant 0 : i32
    %c0_i32_0 = arith.constant 0 : i32
    %c0_i32_1 = arith.constant 0 : i32
    return %arg0, %c0_i32, %c0_i32_0 : i32, i32, i32
  }
  func.func @transform_1(%arg0: i32) -> (i32, i32, i32) {
    %c0_i32 = arith.constant 0 : i32
    %c0_i32_0 = arith.constant 0 : i32
    %c0_i32_1 = arith.constant 0 : i32
    return %arg0, %c0_i32, %c0_i32_0 : i32, i32, i32
  }
  func.func @transform_2(%arg0: i32) -> (i32, i32, i32) {
    %c0_i32 = arith.constant 0 : i32
    %c0_i32_0 = arith.constant 0 : i32
    %c0_i32_1 = arith.constant 0 : i32
    return %arg0, %c0_i32, %c0_i32_0 : i32, i32, i32
  }
  func.func @transform_3(%arg0: i32) -> (i32, i32, i32) {
    %c0_i32 = arith.constant 0 : i32
    %c0_i32_0 = arith.constant 0 : i32
    %c0_i32_1 = arith.constant 0 : i32
    return %arg0, %c0_i32, %c0_i32_0 : i32, i32, i32
  }
  func.func @transform_4(%arg0: i32) -> (i32, i32, i32) {
    %c0_i32 = arith.constant 0 : i32
    %c0_i32_0 = arith.constant 0 : i32
    %c0_i32_1 = arith.constant 0 : i32
    return %arg0, %c0_i32, %c0_i32_0 : i32, i32, i32
  }
}

module attributes {stable_mosaic.version = 11 : i64} {
  func.func @_matmul_kernel(%arg0: i32, %arg1: i32, %arg2: i32, %arg3: memref<16x128xf32, #tpu.memory_space<vmem>>, %arg4: memref<128x128xf32, #tpu.memory_space<vmem>>, %arg5: memref<1x128xf32, #tpu.memory_space<vmem>>, %arg6: memref<16x128xf32, #tpu.memory_space<vmem>>, %arg7: memref<16x128xf32, #tpu.memory_space<vmem>>) attributes {dimension_semantics = [#tpu.dimension_semantics<parallel>, #tpu.dimension_semantics<parallel>, #tpu.dimension_semantics<arbitrary>], iteration_bounds = array<i64: 1, 1, 1>, scalar_prefetch = 0 : i64, scratch_operands = 1 : i64, tpu.core_type = #tpu.core_type<tc>, window_params = [{transform_indices = @transform_0, window_bounds = array<i64: 16, 128>}, {transform_indices = @transform_1, window_bounds = array<i64: 128, 128>}, {transform_indices = @transform_2, window_bounds = array<i64: 1, 128>}, {transform_indices = @transform_3, window_bounds = array<i64: 16, 128>}]} {
    %c0_i32 = arith.constant 0 : i32
    %0 = arith.cmpi eq, %arg2, %c0_i32 : i32
    %1 = arith.extui %0 : i1 to i32
    %c0_i32_0 = arith.constant 0 : i32
    %2 = arith.cmpi ne, %1, %c0_i32_0 : i32
    scf.if %2 {
      %cst_10 = arith.constant 0.000000e+00 : f32
      %12 = vector.broadcast %cst_10 : f32 to vector<16x128xf32>
      %c0_11 = arith.constant 0 : index
      %c0_12 = arith.constant 0 : index
      %13 = vector.load %arg7[%c0_11, %c0_12] : memref<16x128xf32, #tpu.memory_space<vmem>>, vector<16x128xf32>
      tpu.vector_store %arg7[%c0_11, %c0_12], %12 {strides = array<i32>} : memref<16x128xf32, #tpu.memory_space<vmem>>, vector<16x128xf32>,
    } else {
    }
    %c0 = arith.constant 0 : index
    %c0_1 = arith.constant 0 : index
    %3 = vector.load %arg7[%c0, %c0_1] : memref<16x128xf32, #tpu.memory_space<vmem>>, vector<16x128xf32>
    %c0_2 = arith.constant 0 : index
    %c0_3 = arith.constant 0 : index
    %4 = vector.load %arg3[%c0_2, %c0_3] : memref<16x128xf32, #tpu.memory_space<vmem>>, vector<16x128xf32>
    %c0_4 = arith.constant 0 : index
    %c0_5 = arith.constant 0 : index
    %5 = vector.load %arg4[%c0_4, %c0_5] : memref<128x128xf32, #tpu.memory_space<vmem>>, vector<128x128xf32>
    %cst = arith.constant dense<0.000000e+00> : vector<16x128xf32>
    %6 = tpu.matmul %4, %5, %cst {dimension_numbers = #tpu.dot_dimension_numbers<[1], [0], [0], [1], [0, 0, 1, 1], [], []>} : vector<16x128xf32>, vector<128x128xf32>, vector<16x128xf32> -> vector<16x128xf32>
    %7 = arith.addf %3, %6 : vector<16x128xf32>
    %c0_6 = arith.constant 0 : index
    %c0_7 = arith.constant 0 : index
    %8 = vector.load %arg7[%c0_6, %c0_7] : memref<16x128xf32, #tpu.memory_space<vmem>>, vector<16x128xf32>
    tpu.vector_store %arg7[%c0_6, %c0_7], %7 {strides = array<i32>} : memref<16x128xf32, #tpu.memory_space<vmem>>, vector<16x128xf32>,
    %c0_i32_8 = arith.constant 0 : i32
    %9 = arith.cmpi eq, %arg2, %c0_i32_8 : i32
    %10 = arith.extui %9 : i1 to i32
    %c0_i32_9 = arith.constant 0 : i32
    %11 = arith.cmpi ne, %10, %c0_i32_9 : i32
    scf.if %11 {
      %c0_10 = arith.constant 0 : index
      %c0_11 = arith.constant 0 : index
      %12 = vector.load %arg7[%c0_10, %c0_11] : memref<16x128xf32, #tpu.memory_space<vmem>>, vector<16x128xf32>
      %c0_12 = arith.constant 0 : index
      %c0_13 = arith.constant 0 : index
      %13 = vector.load %arg5[%c0_12, %c0_13] : memref<1x128xf32, #tpu.memory_space<vmem>>, vector<1x128xf32>
      %14 = vector.broadcast %13 : vector<1x128xf32> to vector<16x128xf32>
      %15 = arith.addf %12, %14 : vector<16x128xf32>
      %cst_14 = arith.constant 0.000000e+00 : f32
      %16 = vector.broadcast %cst_14 : f32 to vector<16x128xf32>
      %17 = arith.maximumf %15, %16 : vector<16x128xf32>
      %c0_15 = arith.constant 0 : index
      %c0_16 = arith.constant 0 : index
      %18 = vector.load %arg6[%c0_15, %c0_16] : memref<16x128xf32, #tpu.memory_space<vmem>>, vector<16x128xf32>
      tpu.vector_store %arg6[%c0_15, %c0_16], %17 {strides = array<i32>} : memref<16x128xf32, #tpu.memory_space<vmem>>, vector<16x128xf32>,
    } else {
    }
    return
  }
  func.func @transform_0(%arg0: i32, %arg1: i32, %arg2: i32) -> (i32, i32) {
    %c0_i32 = arith.constant 0 : i32
    return %arg0, %arg2 : i32, i32
  }
  func.func @transform_1(%arg0: i32, %arg1: i32, %arg2: i32) -> (i32, i32) {
    %c0_i32 = arith.constant 0 : i32
    return %arg2, %arg1 : i32, i32
  }
  func.func @transform_2(%arg0: i32, %arg1: i32, %arg2: i32) -> (i32, i32) {
    %c0_i32 = arith.constant 0 : i32
    %c0_i32_0 = arith.constant 0 : i32
    return %c0_i32, %arg1 : i32, i32
  }
  func.func @transform_3(%arg0: i32, %arg1: i32, %arg2: i32) -> (i32, i32) {
    %c0_i32 = arith.constant 0 : i32
    return %arg0, %arg1 : i32, i32
  }
}

module attributes {stable_mosaic.version = 11 : i64} {
  func.func @_attn_kernel(%arg0: i32, %arg1: memref<1x8x32xf32, #tpu.memory_space<vmem>>, %arg2: memref<1x8x32xf32, #tpu.memory_space<vmem>>, %arg3: memref<1x8x32xf32, #tpu.memory_space<vmem>>, %arg4: memref<1x1x8xf32, #tpu.memory_space<vmem>>, %arg5: memref<1x8x32xf32, #tpu.memory_space<vmem>>) attributes {dimension_semantics = [#tpu.dimension_semantics<parallel>], iteration_bounds = array<i64: 2>, scalar_prefetch = 0 : i64, scratch_operands = 0 : i64, tpu.core_type = #tpu.core_type<tc>, window_params = [{transform_indices = @transform_0, window_bounds = array<i64: 1, 8, 32>}, {transform_indices = @transform_1, window_bounds = array<i64: 1, 8, 32>}, {transform_indices = @transform_2, window_bounds = array<i64: 1, 8, 32>}, {transform_indices = @transform_3, window_bounds = array<i64: 1, 1, 8>}, {transform_indices = @transform_4, window_bounds = array<i64: 1, 8, 32>}]} {
    %c0 = arith.constant 0 : index
    %c0_0 = arith.constant 0 : index
    %c0_1 = arith.constant 0 : index
    %0 = vector.load %arg1[%c0, %c0_0, %c0_1] : memref<1x8x32xf32, #tpu.memory_space<vmem>>, vector<1x8x32xf32>
    %1 = vector.shape_cast %0 : vector<1x8x32xf32> to vector<8x32xf32>
    %c0_2 = arith.constant 0 : index
    %c0_3 = arith.constant 0 : index
    %c0_4 = arith.constant 0 : index
    %2 = vector.load %arg2[%c0_2, %c0_3, %c0_4] : memref<1x8x32xf32, #tpu.memory_space<vmem>>, vector<1x8x32xf32>
    %3 = vector.shape_cast %2 : vector<1x8x32xf32> to vector<8x32xf32>
    %c0_5 = arith.constant 0 : index
    %c0_6 = arith.constant 0 : index
    %c0_7 = arith.constant 0 : index
    %4 = vector.load %arg3[%c0_5, %c0_6, %c0_7] : memref<1x8x32xf32, #tpu.memory_space<vmem>>, vector<1x8x32xf32>
    %5 = vector.shape_cast %4 : vector<1x8x32xf32> to vector<8x32xf32>
    %c0_8 = arith.constant 0 : index
    %c0_9 = arith.constant 0 : index
    %c0_10 = arith.constant 0 : index
    %6 = vector.load %arg4[%c0_8, %c0_9, %c0_10] : memref<1x1x8xf32, #tpu.memory_space<vmem>>, vector<1x1x8xf32>
    %7 = vector.shape_cast %6 : vector<1x1x8xf32> to vector<1x8xf32>
    %cst = arith.constant 0.000000e+00 : f32
    %8 = vector.broadcast %cst : f32 to vector<1x8xf32>
    %9 = arith.cmpf ogt, %7, %8 : vector<1x8xf32>
    %cst_11 = arith.constant 0.000000e+00 : f32
    %cst_12 = arith.constant -1.000000e+09 : f32
    %10 = vector.broadcast %cst_11 : f32 to vector<1x8xf32>
    %11 = vector.broadcast %cst_12 : f32 to vector<1x8xf32>
    %12 = arith.select %9, %10, %11 : vector<1x8xi1>, vector<1x8xf32>
    %13 = tpu.iota {dimensions = array<i32: 0>} : vector<8x8xi32>
    %14 = tpu.iota {dimensions = array<i32: 1>} : vector<8x8xi32>
    %15 = arith.cmpi sge, %13, %14 : vector<8x8xi32>
    %cst_13 = arith.constant 0.000000e+00 : f32
    %cst_14 = arith.constant -1.000000e+09 : f32
    %16 = vector.broadcast %cst_13 : f32 to vector<8x8xf32>
    %17 = vector.broadcast %cst_14 : f32 to vector<8x8xf32>
    %18 = arith.select %15, %16, %17 : vector<8x8xi1>, vector<8x8xf32>
    %19 = vector.broadcast %12 : vector<1x8xf32> to vector<8x8xf32>
    %20 = arith.addf %19, %18 : vector<8x8xf32>
    %21 = vector.extract_strided_slice %1 {offsets = [0, 0], sizes = [8, 8], strides = [1, 1]} : vector<8x32xf32> to vector<8x8xf32>
    %22 = vector.extract_strided_slice %3 {offsets = [0, 0], sizes = [8, 8], strides = [1, 1]} : vector<8x32xf32> to vector<8x8xf32>
    %23 = vector.extract_strided_slice %5 {offsets = [0, 0], sizes = [8, 8], strides = [1, 1]} : vector<8x32xf32> to vector<8x8xf32>
    %cst_15 = arith.constant dense<0.000000e+00> : vector<8x8xf32>
    %24 = tpu.matmul %21, %22, %cst_15 {dimension_numbers = #tpu.dot_dimension_numbers<[1], [1], [0], [0], [0, 0, 1, 0], [], []>} : vector<8x8xf32>, vector<8x8xf32>, vector<8x8xf32> -> vector<8x8xf32>
    %cst_16 = arith.constant 0.353553385 : f32
    %25 = vector.broadcast %cst_16 : f32 to vector<8x8xf32>
    %26 = arith.mulf %24, %25 : vector<8x8xf32>
    %27 = arith.addf %26, %20 : vector<8x8xf32>
    %cst_17 = arith.constant dense<0xFF800000> : vector<8xf32>
    %28 = vector.multi_reduction <maximumf>, %27, %cst_17 [1] : vector<8x8xf32> to vector<8xf32>
    %29 = vector.shape_cast %28 : vector<8xf32> to vector<8x1xf32>
    %30 = vector.broadcast %29 : vector<8x1xf32> to vector<8x8xf32>
    %31 = arith.subf %27, %30 : vector<8x8xf32>
    %32 = math.exp %31 : vector<8x8xf32>
    %cst_18 = arith.constant dense<0.000000e+00> : vector<8xf32>
    %33 = vector.multi_reduction <add>, %32, %cst_18 [1] : vector<8x8xf32> to vector<8xf32>
    %34 = vector.shape_cast %33 : vector<8xf32> to vector<8x1xf32>
    %35 = tpu.reciprocal %34 {approx = true} : vector<8x1xf32> -> vector<8x1xf32>
    %36 = vector.broadcast %35 : vector<8x1xf32> to vector<8x8xf32>
    %37 = arith.mulf %32, %36 : vector<8x8xf32>
    %cst_19 = arith.constant dense<0.000000e+00> : vector<8x8xf32>
    %38 = tpu.matmul %37, %23, %cst_19 {dimension_numbers = #tpu.dot_dimension_numbers<[1], [0], [0], [1], [0, 0, 1, 1], [], []>} : vector<8x8xf32>, vector<8x8xf32>, vector<8x8xf32> -> vector<8x8xf32>
    %39 = vector.extract_strided_slice %1 {offsets = [0, 8], sizes = [8, 8], strides = [1, 1]} : vector<8x32xf32> to vector<8x8xf32>
    %40 = vector.extract_strided_slice %3 {offsets = [0, 8], sizes = [8, 8], strides = [1, 1]} : vector<8x32xf32> to vector<8x8xf32>
    %41 = vector.extract_strided_slice %5 {offsets = [0, 8], sizes = [8, 8], strides = [1, 1]} : vector<8x32xf32> to vector<8x8xf32>
    %cst_20 = arith.constant dense<0.000000e+00> : vector<8x8xf32>
    %42 = tpu.matmul %39, %40, %cst_20 {dimension_numbers = #tpu.dot_dimension_numbers<[1], [1], [0], [0], [0, 0, 1, 0], [], []>} : vector<8x8xf32>, vector<8x8xf32>, vector<8x8xf32> -> vector<8x8xf32>
    %cst_21 = arith.constant 0.353553385 : f32
    %43 = vector.broadcast %cst_21 : f32 to vector<8x8xf32>
    %44 = arith.mulf %42, %43 : vector<8x8xf32>
    %45 = arith.addf %44, %20 : vector<8x8xf32>
    %cst_22 = arith.constant dense<0xFF800000> : vector<8xf32>
    %46 = vector.multi_reduction <maximumf>, %45, %cst_22 [1] : vector<8x8xf32> to vector<8xf32>
    %47 = vector.shape_cast %46 : vector<8xf32> to vector<8x1xf32>
    %48 = vector.broadcast %47 : vector<8x1xf32> to vector<8x8xf32>
    %49 = arith.subf %45, %48 : vector<8x8xf32>
    %50 = math.exp %49 : vector<8x8xf32>
    %cst_23 = arith.constant dense<0.000000e+00> : vector<8xf32>
    %51 = vector.multi_reduction <add>, %50, %cst_23 [1] : vector<8x8xf32> to vector<8xf32>
    %52 = vector.shape_cast %51 : vector<8xf32> to vector<8x1xf32>
    %53 = tpu.reciprocal %52 {approx = true} : vector<8x1xf32> -> vector<8x1xf32>
    %54 = vector.broadcast %53 : vector<8x1xf32> to vector<8x8xf32>
    %55 = arith.mulf %50, %54 : vector<8x8xf32>
    %cst_24 = arith.constant dense<0.000000e+00> : vector<8x8xf32>
    %56 = tpu.matmul %55, %41, %cst_24 {dimension_numbers = #tpu.dot_dimension_numbers<[1], [0], [0], [1], [0, 0, 1, 1], [], []>} : vector<8x8xf32>, vector<8x8xf32>, vector<8x8xf32> -> vector<8x8xf32>
    %57 = vector.extract_strided_slice %1 {offsets = [0, 16], sizes = [8, 8], strides = [1, 1]} : vector<8x32xf32> to vector<8x8xf32>
    %58 = vector.extract_strided_slice %3 {offsets = [0, 16], sizes = [8, 8], strides = [1, 1]} : vector<8x32xf32> to vector<8x8xf32>
    %59 = vector.extract_strided_slice %5 {offsets = [0, 16], sizes = [8, 8], strides = [1, 1]} : vector<8x32xf32> to vector<8x8xf32>
    %cst_25 = arith.constant dense<0.000000e+00> : vector<8x8xf32>
    %60 = tpu.matmul %57, %58, %cst_25 {dimension_numbers = #tpu.dot_dimension_numbers<[1], [1], [0], [0], [0, 0, 1, 0], [], []>} : vector<8x8xf32>, vector<8x8xf32>, vector<8x8xf32> -> vector<8x8xf32>
    %cst_26 = arith.constant 0.353553385 : f32
    %61 = vector.broadcast %cst_26 : f32 to vector<8x8xf32>
    %62 = arith.mulf %60, %61 : vector<8x8xf32>
    %63 = arith.addf %62, %20 : vector<8x8xf32>
    %cst_27 = arith.constant dense<0xFF800000> : vector<8xf32>
    %64 = vector.multi_reduction <maximumf>, %63, %cst_27 [1] : vector<8x8xf32> to vector<8xf32>
    %65 = vector.shape_cast %64 : vector<8xf32> to vector<8x1xf32>
    %66 = vector.broadcast %65 : vector<8x1xf32> to vector<8x8xf32>
    %67 = arith.subf %63, %66 : vector<8x8xf32>
    %68 = math.exp %67 : vector<8x8xf32>
    %cst_28 = arith.constant dense<0.000000e+00> : vector<8xf32>
    %69 = vector.multi_reduction <add>, %68, %cst_28 [1] : vector<8x8xf32> to vector<8xf32>
    %70 = vector.shape_cast %69 : vector<8xf32> to vector<8x1xf32>
    %71 = tpu.reciprocal %70 {approx = true} : vector<8x1xf32> -> vector<8x1xf32>
    %72 = vector.broadcast %71 : vector<8x1xf32> to vector<8x8xf32>
    %73 = arith.mulf %68, %72 : vector<8x8xf32>
    %cst_29 = arith.constant dense<0.000000e+00> : vector<8x8xf32>
    %74 = tpu.matmul %73, %59, %cst_29 {dimension_numbers = #tpu.dot_dimension_numbers<[1], [0], [0], [1], [0, 0, 1, 1], [], []>} : vector<8x8xf32>, vector<8x8xf32>, vector<8x8xf32> -> vector<8x8xf32>
    %75 = vector.extract_strided_slice %1 {offsets = [0, 24], sizes = [8, 8], strides = [1, 1]} : vector<8x32xf32> to vector<8x8xf32>
    %76 = vector.extract_strided_slice %3 {offsets = [0, 24], sizes = [8, 8], strides = [1, 1]} : vector<8x32xf32> to vector<8x8xf32>
    %77 = vector.extract_strided_slice %5 {offsets = [0, 24], sizes = [8, 8], strides = [1, 1]} : vector<8x32xf32> to vector<8x8xf32>
    %cst_30 = arith.constant dense<0.000000e+00> : vector<8x8xf32>
    %78 = tpu.matmul %75, %76, %cst_30 {dimension_numbers = #tpu.dot_dimension_numbers<[1], [1], [0], [0], [0, 0, 1, 0], [], []>} : vector<8x8xf32>, vector<8x8xf32>, vector<8x8xf32> -> vector<8x8xf32>
    %cst_31 = arith.constant 0.353553385 : f32
    %79 = vector.broadcast %cst_31 : f32 to vector<8x8xf32>
    %80 = arith.mulf %78, %79 : vector<8x8xf32>
    %81 = arith.addf %80, %20 : vector<8x8xf32>
    %cst_32 = arith.constant dense<0xFF800000> : vector<8xf32>
    %82 = vector.multi_reduction <maximumf>, %81, %cst_32 [1] : vector<8x8xf32> to vector<8xf32>
    %83 = vector.shape_cast %82 : vector<8xf32> to vector<8x1xf32>
    %84 = vector.broadcast %83 : vector<8x1xf32> to vector<8x8xf32>
    %85 = arith.subf %81, %84 : vector<8x8xf32>
    %86 = math.exp %85 : vector<8x8xf32>
    %cst_33 = arith.constant dense<0.000000e+00> : vector<8xf32>
    %87 = vector.multi_reduction <add>, %86, %cst_33 [1] : vector<8x8xf32> to vector<8xf32>
    %88 = vector.shape_cast %87 : vector<8xf32> to vector<8x1xf32>
    %89 = tpu.reciprocal %88 {approx = true} : vector<8x1xf32> -> vector<8x1xf32>
    %90 = vector.broadcast %89 : vector<8x1xf32> to vector<8x8xf32>
    %91 = arith.mulf %86, %90 : vector<8x8xf32>
    %cst_34 = arith.constant dense<0.000000e+00> : vector<8x8xf32>
    %92 = tpu.matmul %91, %77, %cst_34 {dimension_numbers = #tpu.dot_dimension_numbers<[1], [0], [0], [1], [0, 0, 1, 1], [], []>} : vector<8x8xf32>, vector<8x8xf32>, vector<8x8xf32> -> vector<8x8xf32>
    %93 = tpu.concatenate %38, %56, %74, %92 in 1 : vector<8x8xf32>, vector<8x8xf32>, vector<8x8xf32>, vector<8x8xf32> -> vector<8x32xf32>
    %c0_35 = arith.constant 0 : index
    %c0_36 = arith.constant 0 : index
    %c0_37 = arith.constant 0 : index
    %94 = vector.load %arg5[%c0_35, %c0_36, %c0_37] : memref<1x8x32xf32, #tpu.memory_space<vmem>>, vector<1x8x32xf32>
    %95 = vector.shape_cast %94 : vector<1x8x32xf32> to vector<8x32xf32>
    %96 = vector.shape_cast %93 : vector<8x32xf32> to vector<1x8x32xf32>
    tpu.vector_store %arg5[%c0_35, %c0_36, %c0_37], %96 {strides = array<i32>} : memref<1x8x32xf32, #tpu.memory_space<vmem>>, vector<1x8x32xf32>,
    return
  }
  func.func @transform_0(%arg0: i32) -> (i32, i32, i32) {
    %c0_i32 = arith.constant 0 : i32
    %c0_i32_0 = arith.constant 0 : i32
    %c0_i32_1 = arith.constant 0 : i32
    return %arg0, %c0_i32, %c0_i32_0 : i32, i32, i32
  }
  func.func @transform_1(%arg0: i32) -> (i32, i32, i32) {
    %c0_i32 = arith.constant 0 : i32
    %c0_i32_0 = arith.constant 0 : i32
    %c0_i32_1 = arith.constant 0 : i32
    return %arg0, %c0_i32, %c0_i32_0 : i32, i32, i32
  }
  func.func @transform_2(%arg0: i32) -> (i32, i32, i32) {
    %c0_i32 = arith.constant 0 : i32
    %c0_i32_0 = arith.constant 0 : i32
    %c0_i32_1 = arith.constant 0 : i32
    return %arg0, %c0_i32, %c0_i32_0 : i32, i32, i32
  }
  func.func @transform_3(%arg0: i32) -> (i32, i32, i32) {
    %c0_i32 = arith.constant 0 : i32
    %c0_i32_0 = arith.constant 0 : i32
    %c0_i32_1 = arith.constant 0 : i32
    return %arg0, %c0_i32, %c0_i32_0 : i32, i32, i32
  }
  func.func @transform_4(%arg0: i32) -> (i32, i32, i32) {
    %c0_i32 = arith.constant 0 : i32
    %c0_i32_0 = arith.constant 0 : i32
    %c0_i32_1 = arith.constant 0 : i32
    return %arg0, %c0_i32, %c0_i32_0 : i32, i32, i32
  }
}

</mosaic_0001>

<bundles_post_ra>
// kernel: gnn_transformer_forward.39
= control target key start
LH: loop header
LB: loop body
LE: loop exit
PB: predicated region body
PF: predicated region fallthrough
CT: control target
= control target key end

     0   :  { %s308_s1 = inlined_call_operand.vmem [shape: f32[128,128], index: 1, kind: input, shape index: {}]   ;;  %s309_s0 = inlined_call_operand.vmem [shape: f32[16,128], index: 0, kind: input, shape index: {}]   ;;  %s310_s2 = inlined_call_operand.vmem [shape: f32[1,128], index: 2, kind: input, shape index: {}]   ;;  %s311_s3 = inlined_call_operand.vmem [shape: f32[16,128], index: 3, kind: output, shape index: {}]  }
   0x1   :  { %v24_v0 = vld [vmem:[%s308_s1] sm:$0xff]  ;;  %v25_v1 = vld [vmem:[%s308_s1 + $0x8] sm:$0xff]  ;;  %v26_v2 = vld [vmem:[%s308_s1 + $0x10] sm:$0xff] }
   0x2   :  { %v193_v3 = vpack.c.bf16 %v25_v1, %v24_v0  ;;  %v27_v4 = vld [vmem:[%s308_s1 + $0x18] sm:$0xff]  ;;  %v28_v6 = vld [vmem:[%s308_s1 + $0x20] sm:$0xff]  ;;  %v29_v7 = vld [vmem:[%s308_s1 + $0x28] sm:$0xff] }
   0x3   :  { %v197_v5 = vpack.c.bf16 %v27_v4, %v26_v2  ;;  %v201_v8 = vpack.c.bf16 %v29_v7, %v28_v6  ;;  %v22_v9 = vld [vmem:[%s309_s0] sm:$0xff]  ;;  %v30_v10 = vld [vmem:[%s308_s1 + $0x30] sm:$0xff]  ;;  %v31_v11 = vld [vmem:[%s308_s1 + $0x38] sm:$0xff] }
   0x4   :  { %194 = vmatprep.subr.bf16.mxu0 %v193_v3  ;;  %190 = vmatprep.mubr.f32.mxu0 %v22_v9  ;;  %v205_v12 = vpack.c.bf16 %v31_v11, %v30_v10  ;;  %v32_v13 = vld [vmem:[%s308_s1 + $0x40] sm:$0xff]  ;;  %v33_v14 = vld [vmem:[%s308_s1 + $0x48] sm:$0xff]  ;;  %v34_v16 = vld [vmem:[%s308_s1 + $0x50] sm:$0xff] }
   0x5   :  { %196 = vmatpush3.bf16.msra.mxu0 %v193_v3  ;;  %v209_v15 = vpack.c.bf16 %v33_v14, %v32_v13  ;;  %v35_v17 = vld [vmem:[%s308_s1 + $0x58] sm:$0xff]  ;;  %v36_v19 = vld [vmem:[%s308_s1 + $0x60] sm:$0xff]  ;;  %v37_v20 = vld [vmem:[%s308_s1 + $0x68] sm:$0xff] }
   0x6   :  { %198 = vmatprep.subr.bf16.mxu0 %v197_v5  ;;  %v213_v18 = vpack.c.bf16 %v35_v17, %v34_v16  ;;  %v217_v21 = vpack.c.bf16 %v37_v20, %v36_v19  ;;  %v38_v22 = vld [vmem:[%s308_s1 + $0x70] sm:$0xff]  ;;  %v39_v23 = vld [vmem:[%s308_s1 + $0x78] sm:$0xff]  ;;  %v23_v25 = vld [vmem:[%s309_s0 + $0x8] sm:$0xff] }
   0x7   :  { %v221_v24 = vpack.c.bf16 %v39_v23, %v38_v22  ;;  %v139_v26 = vld [vmem:[%s310_s2] ss:$0 sm:$0xff] }
   0x9   :  { %200 = vmatpush3.bf16.msra.mxu0 %v197_v5 }
   0xa   :  { %202 = vmatprep.subr.bf16.mxu0 %v201_v8 }
   0xd   :  { %204 = vmatpush3.bf16.msra.mxu0 %v201_v8 }
   0xe   :  { %206 = vmatprep.subr.bf16.mxu0 %v205_v12 }
  0x11   :  { %208 = vmatpush3.bf16.msra.mxu0 %v205_v12 }
  0x12   :  { %210 = vmatprep.subr.bf16.mxu0 %v209_v15 }
  0x15   :  { %212 = vmatpush3.bf16.msra.mxu0 %v209_v15 }
  0x16   :  { %214 = vmatprep.subr.bf16.mxu0 %v213_v18 }
  0x19   :  { %216 = vmatpush3.bf16.msra.mxu0 %v213_v18 }
  0x1a   :  { %218 = vmatprep.subr.bf16.mxu0 %v217_v21 }
  0x1d   :  { %220 = vmatpush3.bf16.msra.mxu0 %v217_v21 }
  0x1e   :  { %222 = vmatprep.subr.bf16.mxu0 %v221_v24 }
  0x21   :  { %224 = vmatpush3.bf16.msra.mxu0 %v221_v24 }
  0x24   :  { %191 = vmatmul.mubr.f32.vlgmr.msra.gmra.mrb[0].mxu0 %v23_v25 }
  0xf7   :  { %v192_v27 = vpop.f32.mrb[0].mxu0 }
  0xf8   :  { %v132_v28 = vadd.f32 %v192_v27, %v139_v26  ;;  %v106_v29 = vpop.f32.mrb[1].mxu0 }
  0xf9   :  { %v131_v30 = vadd.f32 %v139_v26, %v106_v29 }
  0xfa   :  { %134 = vst [vmem:[%s311_s3 + $0x8] sm:$0xff] %v132_v28 }
  0xfb   :  { %133 = vst [vmem:[%s311_s3] sm:$0xff] %v131_v30 }

// kernel: gnn_transformer_forward.42
= control target key start
LH: loop header
LB: loop body
LE: loop exit
PB: predicated region body
PF: predicated region fallthrough
CT: control target
= control target key end

     0   :  { %vm23_vm0 = vcmask 261120   ;;  %s136_s0 = inlined_call_operand.vmem [shape: f32[16,32], index: 0, kind: input, shape index: {}]   ;;  %s137_s1 = inlined_call_operand.vmem [shape: f32[16,32], index: 1, kind: input, shape index: {}]   ;;  %s138_s2 = inlined_call_operand.vmem [shape: f32[1,32], index: 2, kind: input, shape index: {}]   ;;  %s139_s3 = inlined_call_operand.vmem [shape: f32[1,32], index: 3, kind: input, shape index: {}]   ;;  %s140_s4 = inlined_call_operand.vmem [shape: f32[16,32], index: 4, kind: output, shape index: {}]  }
   0x1   :  { %v17_v0 = vld [vmem:[%s136_s0] sm:$0xff]  ;;  %v18_v2 = vld [vmem:[%s136_s0 + $0x8] sm:$0xff] }
   0x2   :  { %v19_v1 = vld [vmem:[%s137_s1] sm:$0xff]  ;;  %v20_v4 = vld [vmem:[%s137_s1 + $0x8] sm:$0xff] }
   0x3   :  { %v21_v3 = vadd.f32 %v19_v1, %v17_v0  ;;  %v22_v5 = vadd.f32 %v20_v4, %v18_v2  ;;  %v75_v25 = vld [vmem:[%s138_s2] ss:$0 sm:$0xff] }
   0x4   :  { %v76_v27 = vld [vmem:[%s139_s3] ss:$0 sm:$0xff] }
   0x5   :  { %v24_v6 = vsel %vm23_vm0, %v21_v3, 0.0  ;;  %v27_v7 = vsel %vm23_vm0, %v22_v5, 0.0 }
   0x6   :  { %25 = vadd.xlane.f32.xlu0 %v24_v6 }
   0xa   :  { %28 = vadd.xlane.f32.xlu0 %v27_v7 }
  0x93   :  { %v26_v8 = vpop.xlane.xlu0 %25 }
  0x94   :  { %v31_v9 = vmul.f32 0.03125, %v26_v8 }
  0x96   :  { %v33_v10 = vsub.f32 %v21_v3, %v31_v9 }
  0x97   :  { %v29_v11 = vpop.xlane.xlu0 %28 }
  0x98   :  { %v32_v12 = vmul.f32 0.03125, %v29_v11  ;;  %v35_v13 = vmul.f32 %v33_v10, %v33_v10 }
  0x9a   :  { %v34_v14 = vsub.f32 %v22_v5, %v32_v12  ;;  %v37_v15 = vsel %vm23_vm0, %v35_v13, 0.0 }
  0x9b   :  { %38 = vadd.xlane.f32.xlu1 %v37_v15 }
  0x9c   :  { %v36_v16 = vmul.f32 %v34_v14, %v34_v14 }
  0x9e   :  { %v40_v17 = vsel %vm23_vm0, %v36_v16, 0.0 }
  0x9f   :  { %41 = vadd.xlane.f32.xlu1 %v40_v17 }
 0x128   :  { %v39_v18 = vpop.xlane.xlu1 %38 }
 0x129   :  { %v43_v19 = vmul.f32 0.03125, %v39_v18 }
 0x12b   :  { %v45_v20 = vadd.f32 1e-05, %v43_v19 }
 0x12c   :  { %v42_v21 = vpop.xlane.xlu1 %41 }
 0x12d   :  { %77 = vrsqrt.f32 %v45_v20  ;;  %v44_v22 = vmul.f32 0.03125, %v42_v21 }
 0x12f   :  { %v46_v23 = vadd.f32 1e-05, %v44_v22 }
 0x131   :  { %79 = vrsqrt.f32 %v46_v23 }
 0x137   :  { %v78_v24 = vpop.eup %77 }
 0x138   :  { %v49_v26 = vmul.f32 %v78_v24, %v33_v10 }
 0x13a   :  { %v58_v28 = vmul.f32 %v75_v25, %v49_v26 }
 0x13b   :  { %v80_v29 = vpop.eup %79 }
 0x13c   :  { %v67_v30 = vadd.f32 %v76_v27, %v58_v28  ;;  %v50_v31 = vmul.f32 %v80_v29, %v34_v14 }
 0x13e   :  { %69 = vst.msk [vmem:[%s140_s4] sm:$0xff] %vm23_vm0, %v67_v30  ;;  %v59_v32 = vmul.f32 %v75_v25, %v50_v31 }
 0x140   :  { %v68_v33 = vadd.f32 %v76_v27, %v59_v32 }
 0x142   :  { %70 = vst.msk [vmem:[%s140_s4 + $0x8] sm:$0xff] %vm23_vm0, %v68_v33 }

// kernel: gnn_transformer_forward.43
= control target key start
LH: loop header
LB: loop body
LE: loop exit
PB: predicated region body
PF: predicated region fallthrough
CT: control target
= control target key end

     0   :  { %s310_s1 = inlined_call_operand.vmem [shape: f32[128,128], index: 1, kind: input, shape index: {}]   ;;  %s311_s0 = inlined_call_operand.vmem [shape: f32[16,128], index: 0, kind: input, shape index: {}]   ;;  %s312_s2 = inlined_call_operand.vmem [shape: f32[1,128], index: 2, kind: input, shape index: {}]   ;;  %s313_s3 = inlined_call_operand.vmem [shape: f32[16,128], index: 3, kind: output, shape index: {}]  }
   0x1   :  { %v24_v0 = vld [vmem:[%s310_s1] sm:$0xff]  ;;  %v25_v1 = vld [vmem:[%s310_s1 + $0x8] sm:$0xff]  ;;  %v26_v2 = vld [vmem:[%s310_s1 + $0x10] sm:$0xff] }
   0x2   :  { %v195_v3 = vpack.c.bf16 %v25_v1, %v24_v0  ;;  %v27_v4 = vld [vmem:[%s310_s1 + $0x18] sm:$0xff]  ;;  %v28_v6 = vld [vmem:[%s310_s1 + $0x20] sm:$0xff]  ;;  %v29_v7 = vld [vmem:[%s310_s1 + $0x28] sm:$0xff] }
   0x3   :  { %v199_v5 = vpack.c.bf16 %v27_v4, %v26_v2  ;;  %v203_v8 = vpack.c.bf16 %v29_v7, %v28_v6  ;;  %v22_v9 = vld [vmem:[%s311_s0] sm:$0xff]  ;;  %v30_v10 = vld [vmem:[%s310_s1 + $0x30] sm:$0xff]  ;;  %v31_v11 = vld [vmem:[%s310_s1 + $0x38] sm:$0xff] }
   0x4   :  { %196 = vmatprep.subr.bf16.mxu0 %v195_v3  ;;  %192 = vmatprep.mubr.f32.mxu0 %v22_v9  ;;  %v207_v12 = vpack.c.bf16 %v31_v11, %v30_v10  ;;  %v32_v13 = vld [vmem:[%s310_s1 + $0x40] sm:$0xff]  ;;  %v33_v14 = vld [vmem:[%s310_s1 + $0x48] sm:$0xff]  ;;  %v34_v16 = vld [vmem:[%s310_s1 + $0x50] sm:$0xff] }
   0x5   :  { %198 = vmatpush3.bf16.msra.mxu0 %v195_v3  ;;  %v211_v15 = vpack.c.bf16 %v33_v14, %v32_v13  ;;  %v35_v17 = vld [vmem:[%s310_s1 + $0x58] sm:$0xff]  ;;  %v36_v19 = vld [vmem:[%s310_s1 + $0x60] sm:$0xff]  ;;  %v37_v20 = vld [vmem:[%s310_s1 + $0x68] sm:$0xff] }
   0x6   :  { %200 = vmatprep.subr.bf16.mxu0 %v199_v5  ;;  %v215_v18 = vpack.c.bf16 %v35_v17, %v34_v16  ;;  %v219_v21 = vpack.c.bf16 %v37_v20, %v36_v19  ;;  %v38_v22 = vld [vmem:[%s310_s1 + $0x70] sm:$0xff]  ;;  %v39_v23 = vld [vmem:[%s310_s1 + $0x78] sm:$0xff]  ;;  %v23_v25 = vld [vmem:[%s311_s0 + $0x8] sm:$0xff] }
   0x7   :  { %v223_v24 = vpack.c.bf16 %v39_v23, %v38_v22  ;;  %v141_v26 = vld [vmem:[%s312_s2] ss:$0 sm:$0xff] }
   0x9   :  { %202 = vmatpush3.bf16.msra.mxu0 %v199_v5 }
   0xa   :  { %204 = vmatprep.subr.bf16.mxu0 %v203_v8 }
   0xd   :  { %206 = vmatpush3.bf16.msra.mxu0 %v203_v8 }
   0xe   :  { %208 = vmatprep.subr.bf16.mxu0 %v207_v12 }
  0x11   :  { %210 = vmatpush3.bf16.msra.mxu0 %v207_v12 }
  0x12   :  { %212 = vmatprep.subr.bf16.mxu0 %v211_v15 }
  0x15   :  { %214 = vmatpush3.bf16.msra.mxu0 %v211_v15 }
  0x16   :  { %216 = vmatprep.subr.bf16.mxu0 %v215_v18 }
  0x19   :  { %218 = vmatpush3.bf16.msra.mxu0 %v215_v18 }
  0x1a   :  { %220 = vmatprep.subr.bf16.mxu0 %v219_v21 }
  0x1d   :  { %222 = vmatpush3.bf16.msra.mxu0 %v219_v21 }
  0x1e   :  { %224 = vmatprep.subr.bf16.mxu0 %v223_v24 }
  0x21   :  { %226 = vmatpush3.bf16.msra.mxu0 %v223_v24 }
  0x24   :  { %193 = vmatmul.mubr.f32.vlgmr.msra.gmra.mrb[0].mxu0 %v23_v25 }
  0xf7   :  { %v194_v27 = vpop.f32.mrb[0].mxu0 }
  0xf8   :  { %v132_v28 = vadd.f32 %v194_v27, %v141_v26  ;;  %v106_v29 = vpop.f32.mrb[1].mxu0 }
  0xf9   :  { %v131_v30 = vadd.f32 %v141_v26, %v106_v29 }
  0xfa   :  { %v134_v31 = vmax.f32 %v132_v28, 0.0 }
  0xfb   :  { %v133_v32 = vmax.f32 %v131_v30, 0.0 }
  0xfc   :  { %136 = vst [vmem:[%s313_s3 + $0x8] sm:$0xff] %v134_v31 }
  0xfd   :  { %135 = vst [vmem:[%s313_s3] sm:$0xff] %v133_v32 }

// kernel: gnn_transformer_forward.40
= control target key start
LH: loop header
LB: loop body
LE: loop exit
PB: predicated region body
PF: predicated region fallthrough
CT: control target
= control target key end

     0   :  { %s1177_s15 = smov 0   ;;  %s1278_s0 = inlined_call_operand.vmem [shape: f32[2,8,32], index: 0, kind: input, shape index: {}]   ;;  %s1279_s1 = inlined_call_operand.vmem [shape: f32[2,8,32], index: 1, kind: input, shape index: {}]   ;;  %s1280_s2 = inlined_call_operand.vmem [shape: f32[2,8,32], index: 2, kind: input, shape index: {}]   ;;  %s1281_s3 = inlined_call_operand.vmem [shape: f32[2,1,8], index: 3, kind: input, shape index: {}]   ;;  %s1282_s4 = inlined_call_operand.vmem [shape: f32[2,8,32], index: 4, kind: output, shape index: {}]  }
   0x1 LB: > { %s1023_s16 = sadd.s32 4294967295, %s1141_s15   ;;  %p1027_p0 = scmp.ge.s32.totalorder %s1141_s15, 1  ;;  %s1141_s15 = sphi %s1177_s15, %s14_s15  }
   0x2   : > { %p187_p1 = scmp.lt.s32.totalorder %s1141_s15, 3 }
   0x4   : > { %p188_p2 = pnand %p1027_p0, %p187_p1 }
   0x5   : > { %p222_p3 = scmp.lt.s32.totalorder (!%p188_p2), %s1023_s16, 1  ;;  %v1143_v0 = vmov (!%p188_p2), 0.0   ;;  %vm1144_vm0 = vmmov (!%p188_p2), 0   ;;  %vm247_vm1 = vcmask (!%p188_p2), 64512   ;;  %v326_v3 = vlaneseq (!%p188_p2)  ;;  %s1146_s27 = smov (!%p188_p2), 120  }
   0x6   : > { %191 = sbr.rel (%p188_p2) target bundleno = 1466 (0x5ba), region = 36  ;;  %1062 = vmatprep.subr.mxu0 (!%p188_p2), %v1143_v0  ;;  %1064 = vmatprep.mubr.msk.f32.mxu0 (!%p188_p2), %vm1144_vm0, %v1143_v0  ;;  %v1145_v7 = vmov (!%p188_p2), -1e+09   ;;  %s1147_s28 = smov (!%p188_p2), 112   ;;  %vm931_vm3 = vcmask (!%p188_p2), 130048   ;;  %vm933_vm4 = vcmask (!%p188_p2), 195584  }
   0x7   : > { %1067 = vmatprep.subr.mxu1 (!%p188_p2), %v1143_v0  ;;  %1069 = vmatprep.mubr.msk.f32.mxu1 (!%p188_p2), %vm1144_vm0, %v1143_v0  ;;  %v327_v5 = vshrl.u32 (!%p188_p2), %v326_v3, 7  ;;  %s1148_s29 = smov (!%p188_p2), 104   ;;  %s1149_s7 = smov (!%p188_p2), 8   ;;  %vm935_vm5 = vcmask (!%p188_p2), 261120  }
   0x8   : > { %s1150_s8 = smov (!%p188_p2), 16   ;;  %s1151_s9 = smov (!%p188_p2), 24  }
   0x9   : > { %v328_v6 = vsub.s32 (!%p188_p2), 0, %v327_v5 }
   0xd   : > { %s1284_s16 = smov (!%p222_p3, %s1023_s16), 1 }
   0xe   : > { %s1191_s17 = sshll.u32 %s1284_s16, 3  ;;  %s236_s26 = scalar_lea.vmem %s1281_s3, %s1284_s16 }
   0xf   : > { %s229_s20 = scalar_lea.vmem %s1279_s1, %s1191_s17  ;;  %s225_s23 = scalar_lea.vmem %s1278_s0, %s1191_s17  ;;  %v244_v4 = vld [vmem:[%s236_s26] sm:$0x1] }
  0x10   : > { %v242_v1 = vld [vmem:[%s229_s20] sm:$0xff]  ;;  %vm245_vm2 = vcmp.gt.f32.partialorder %v244_v4, 0.0  ;;  %s233_s6 = scalar_lea.vmem %s1280_s2, %s1191_s17  ;;  %s240_s12 = scalar_lea.vmem %s1282_s4, %s1191_s17 }
  0x11   : > { %1063 = vmatpush3.xpose.msk.msra.mxu0 %vm247_vm1, %v242_v1  ;;  %v241_v2 = vld [vmem:[%s225_s23] sm:$0xff]  ;;  %v246_v8 = vsel %vm245_vm2, 0.0, %v1145_v7  ;;  %418 = vrot.lane.b32.xlu1 %v242_v1, %s1146_s27 }
  0x12   : > { %1077 = vmatprep.subr.mxu0 %v1143_v0  ;;  %v1209_v9 = vrot.slane %v246_v8, %v328_v6  ;;  %v1223_v20 = vld [vmem:[%s233_s6] sm:$0xff] }
  0x13   : > { %1068 = vmatpush3.msra.mxu1 %v1223_v20 }
  0x14   : > { %1065 = vmatmul.mubr.msk.f32.vlgmr.msra.gmra.mrb[0].mxu0 %vm247_vm1, %v241_v2  ;;  %1072 = vmatprep.subr.mxu1 %v1143_v0 }
  0x15   : > { %1079 = vmatprep.mubr.msk.f32.mxu0 %vm1144_vm0, %v1143_v0  ;;  %416 = vrot.lane.b32.xlu1 %v241_v2, %s1146_s27 }
  0x19   : > { %584 = vrot.lane.b32.xlu1 %v241_v2, %s1147_s28 }
  0x1d   : > { %753 = vrot.lane.b32.xlu1 %v242_v1, %s1148_s29 }
  0x21   : > { %751 = vrot.lane.b32.xlu1 %v241_v2, %s1148_s29 }
  0x83   : > { %v419_v21 = vpop.permute.xlu1 %418 }
  0x87   : > { %v417_v23 = vpop.permute.xlu1 %416 }
  0x8b   : > { %v585_v25 = vpop.permute.xlu1 %584 }
  0x8f   : > { %v754_v28 = vpop.permute.xlu1 %753 }
  0x93   : > { %v752_v29 = vpop.permute.xlu1 %751 }
  0xe7   : > { %v320_v10 = vpop.f32.mrb[0].mxu0 }
  0xe8   : > { %v324_v11 = vmul.f32 0.35355338, %v320_v10  ;;  %v1066_v12 = vpop.f32.mrb[1].mxu0 }
  0xea   : > { %v331_v13 = vadd.f32 %v1209_v9, %v324_v11 }
  0xec   : > { %v332_v14 = vsel %vm247_vm1, %v331_v13, -inf }
  0xed   : > { %333 = vmax.xlane.f32.xlu0 %v332_v14 }
 0x17a   : > { %v334_v15 = vpop.xlane.xlu0 %333 }
 0x17b   : > { %v335_v16 = vsub.f32 %v331_v13, %v334_v15 }
 0x17d   : > { %v336_v17 = vmul.f32 1.442695, %v335_v16 }
 0x17f   : > { %1119 = vpow2.f32 %v336_v17 }
 0x189   : > { %v1120_v18 = vpop.eup %1119 }
 0x18a   : > { %v338_v19 = vsel %vm247_vm1, %v1120_v18, 0.0 }
 0x18b   : > { %339 = vadd.xlane.f32.xlu0 %v338_v19 }
 0x1a1   : > { %586 = vrot.lane.b32.xlu0 %v242_v1, %s1147_s28 }
 0x218   : > { %v340_v22 = vpop.xlane.xlu0 %339 }
 0x219   : > { %1121 = vrcp.f32 %v340_v22 }
 0x21c   : > { %v587_v27 = vpop.permute.xlu0 %586 }
 0x223   : > { %v1122_v24 = vpop.eup %1121 }
 0x224   : > { %v342_v26 = vmul.f32 %v1122_v24, %v1120_v18 }
 0x226   : > { %1070 = vmatmul.mubr.msk.f32.vlgmr.msra.gmra.mrb[0].mxu1 %vm247_vm1, %v342_v26 }
 0x227   : > { %1073 = vmatpush3.xpose.msk.msra.mxu1 %vm247_vm1, %v419_v21  ;;  %1074 = vmatprep.mubr.msk.f32.mxu1 %vm1144_vm0, %v1143_v0 }
 0x228   : > { %1082 = vmatprep.subr.mxu1 %v1143_v0 }
 0x22a   : > { %1075 = vmatmul.mubr.msk.f32.vlgmr.msra.gmra.mrb[2].mxu1 %vm247_vm1, %v417_v23 }
 0x22b   : > { %1083 = vmatpush3.xpose.msk.msra.mxu1 %vm247_vm1, %v587_v27  ;;  %1084 = vmatprep.mubr.msk.f32.mxu1 %vm1144_vm0, %v1143_v0 }
 0x22c   : > { %1092 = vmatprep.subr.mxu1 %v1143_v0 }
 0x22e   : > { %1085 = vmatmul.mubr.msk.f32.vlgmr.msra.gmra.mrb[4].mxu1 %vm247_vm1, %v585_v25 }
 0x22f   : > { %1093 = vmatpush3.xpose.msk.msra.mxu1 %vm247_vm1, %v754_v28  ;;  %1094 = vmatprep.mubr.msk.f32.mxu1 %vm1144_vm0, %v1143_v0 }
 0x232   : > { %1095 = vmatmul.mubr.msk.f32.vlgmr.msra.gmra.mrb[6].mxu1 %vm247_vm1, %v752_v29 }
 0x2f9   : > { %v1243_v30 = vpop.f32.mrb[0].mxu1 }
 0x2fa   : > { %v1071_v31 = vpop.f32.mrb[1].mxu1 }
 0x2fd   : > { %v490_v32 = vpop.f32.mrb[2].mxu1 }
 0x2fe   : > { %v494_v33 = vmul.f32 0.35355338, %v490_v32  ;;  %v1076_v34 = vpop.f32.mrb[3].mxu1 }
 0x300   : > { %v495_v35 = vadd.f32 %v494_v33, %v1209_v9 }
 0x301   : > { %v658_v36 = vpop.f32.mrb[4].mxu1 }
 0x302   : > { %v662_v37 = vmul.f32 0.35355338, %v658_v36  ;;  %v496_v38 = vsel %vm247_vm1, %v495_v35, -inf  ;;  %v1086_v39 = vpop.f32.mrb[5].mxu1 }
 0x303   : > { %497 = vmax.xlane.f32.xlu1 %v496_v38 }
 0x304   : > { %v663_v40 = vadd.f32 %v662_v37, %v1209_v9 }
 0x305   : > { %v825_v41 = vpop.f32.mrb[6].mxu1 }
 0x306   : > { %v829_v42 = vmul.f32 0.35355338, %v825_v41  ;;  %v664_v43 = vsel %vm247_vm1, %v663_v40, -inf  ;;  %v1096_v44 = vpop.f32.mrb[7].mxu1 }
 0x307   : > { %665 = vmax.xlane.f32.xlu0 %v664_v43 }
 0x308   : > { %v830_v45 = vadd.f32 %v829_v42, %v1209_v9 }
 0x30a   : > { %v831_v46 = vsel %vm247_vm1, %v830_v45, -inf }
 0x30b   : > { %832 = vmax.xlane.f32.xlu1 %v831_v46 }
 0x390   : > { %v498_v47 = vpop.xlane.xlu1 %497 }
 0x391   : > { %v499_v48 = vsub.f32 %v495_v35, %v498_v47 }
 0x393   : > { %v500_v49 = vmul.f32 1.442695, %v499_v48 }
 0x394   : > { %v666_v50 = vpop.xlane.xlu0 %665 }
 0x395   : > { %1123 = vpow2.f32 %v500_v49  ;;  %v667_v51 = vsub.f32 %v663_v40, %v666_v50 }
 0x397   : > { %v668_v52 = vmul.f32 1.442695, %v667_v51 }
 0x398   : > { %v833_v57 = vpop.xlane.xlu1 %832 }
 0x399   : > { %1125 = vpow2.f32 %v668_v52  ;;  %v834_v58 = vsub.f32 %v830_v45, %v833_v57 }
 0x39b   : > { %v835_v59 = vmul.f32 1.442695, %v834_v58 }
 0x39d   : > { %1127 = vpow2.f32 %v835_v59 }
 0x39f   : > { %v1124_v53 = vpop.eup %1123 }
 0x3a0   : > { %v502_v54 = vsel %vm247_vm1, %v1124_v53, 0.0 }
 0x3a1   : > { %503 = vadd.xlane.f32.xlu1 %v502_v54 }
 0x3a3   : > { %v1126_v55 = vpop.eup %1125 }
 0x3a4   : > { %v670_v56 = vsel %vm247_vm1, %v1126_v55, 0.0 }
 0x3a5   : > { %671 = vadd.xlane.f32.xlu0 %v670_v56 }
 0x3a7   : > { %v1128_v60 = vpop.eup %1127 }
 0x3a8   : > { %v837_v61 = vsel %vm247_vm1, %v1128_v60, 0.0 }
 0x3b2   : > { %675 = vrot.lane.b32.xlu1 %v1223_v20, %s1147_s28 }
 0x3bb   : > { %508 = vrot.lane.b32.xlu0 %v1223_v20, %s1146_s27 }
 0x3d6   : > { %838 = vadd.xlane.f32.xlu1 %v837_v61 }
 0x3e7   : > { %842 = vrot.lane.b32.xlu1 %v1223_v20, %s1148_s29 }
 0x42e   : > { %v504_v62 = vpop.xlane.xlu1 %503 }
 0x42f   : > { %1129 = vrcp.f32 %v504_v62 }
 0x432   : > { %v672_v63 = vpop.xlane.xlu0 %671  ;;  %v676_v4 = vpop.permute.xlu1 %675 }
 0x433   : > { %1131 = vrcp.f32 %v672_v63 }
 0x436   : > { %v509_v1 = vpop.permute.xlu0 %508 }
 0x437   : > { %1078 = vmatpush3.msra.mxu0 %v509_v1 }
 0x438   : > { %1087 = vmatprep.subr.mxu0 %v1143_v0 }
 0x439   : > { %v1130_v2 = vpop.eup %1129 }
 0x43a   : > { %v506_v3 = vmul.f32 %v1130_v2, %v1124_v53 }
 0x43c   : > { %1080 = vmatmul.mubr.msk.f32.vlgmr.msra.gmra.mrb[2].mxu0 %vm247_vm1, %v506_v3 }
 0x43d   : > { %v1132_v5 = vpop.eup %1131  ;;  %1088 = vmatpush3.msra.mxu0 %v676_v4  ;;  %1089 = vmatprep.mubr.msk.f32.mxu0 %vm1144_vm0, %v1143_v0 }
 0x43e   : > { %v674_v6 = vmul.f32 %v1132_v5, %v1126_v55  ;;  %1097 = vmatprep.subr.mxu0 %v1143_v0 }
 0x440   : > { %1090 = vmatmul.mubr.msk.f32.vlgmr.msra.gmra.mrb[4].mxu0 %vm247_vm1, %v674_v6 }
 0x441   : > { %1099 = vmatprep.mubr.msk.f32.mxu0 %vm1144_vm0, %v1143_v0 }
 0x463   : > { %v839_v7 = vpop.xlane.xlu1 %838 }
 0x464   : > { %1133 = vrcp.f32 %v839_v7 }
 0x467   : > { %v843_v8 = vpop.permute.xlu1 %842 }
 0x468   : > { %1098 = vmatpush3.msra.mxu0 %v843_v8 }
 0x46e   : > { %v1134_v9 = vpop.eup %1133 }
 0x46f   : > { %v841_v10 = vmul.f32 %v1134_v9, %v1128_v60 }
 0x471   : > { %1100 = vmatmul.mubr.msk.f32.vlgmr.msra.gmra.mrb[6].mxu0 %vm247_vm1, %v841_v10 }
 0x50f   : > { %v580_v11 = vpop.f32.mrb[2].mxu0 }
 0x510   : > { %919 = vrot.lane.b32.xlu0 %v580_v11, %s1149_s7  ;;  %v1081_v12 = vpop.f32.mrb[3].mxu0 }
 0x513   : > { %v747_v13 = vpop.f32.mrb[4].mxu0 }
 0x514   : > { %923 = vrot.lane.b32.xlu1 %v747_v13, %s1150_s8  ;;  %v1091_v14 = vpop.f32.mrb[5].mxu0 }
 0x544   : > { %v914_v15 = vpop.f32.mrb[6].mxu0 }
 0x545   : > { %927 = vrot.lane.b32.xlu0 %v914_v15, %s1151_s9  ;;  %v1101_v0 = vpop.f32.mrb[7].mxu0 }
 0x582   : > { %v920_v16 = vpop.permute.xlu0 %919 }
 0x583   : > { %v930_v18 = vsel %vm247_vm1, %v1243_v30, %v920_v16 }
 0x586   : > { %v924_v17 = vpop.permute.xlu1 %923 }
 0x587   : > { %v932_v19 = vsel %vm931_vm3, %v930_v18, %v924_v17 }
 0x5b7   : > { %v928_v20 = vpop.permute.xlu0 %927 }
 0x5b8   : > { %v934_v21 = vsel %vm933_vm4, %v932_v19, %v928_v20 }
 0x5b9   : > { %936 = vst.msk [vmem:[%s240_s12] sm:$0xff] %vm935_vm5, %v934_v21 }
 0x5ba PF: > { %s14_s15 = sadd.s32 1, %s1141_s15  }
 0x5bb   : > { %p11_p4 = scmp.ge.s32.totalorder %s14_s15, 4  }
 0x5bd   :  { %13 = sbr.rel (!%p11_p4) target bundleno = 1 (0x1), region = 75 }

// kernel: gnn_transformer_forward.54
= control target key start
LH: loop header
LB: loop body
LE: loop exit
PB: predicated region body
PF: predicated region fallthrough
CT: control target
= control target key end

     0   :  { %s1184_s15 = smov 0   ;;  %s1285_s0 = inlined_call_operand.vmem [shape: f32[2,8,32], index: 0, kind: input, shape index: {}]   ;;  %s1286_s1 = inlined_call_operand.vmem [shape: f32[2,8,32], index: 1, kind: input, shape index: {}]   ;;  %s1287_s2 = inlined_call_operand.vmem [shape: f32[2,8,32], index: 2, kind: input, shape index: {}]   ;;  %s1288_s3 = inlined_call_operand.vmem [shape: f32[2,1,8], index: 3, kind: input, shape index: {}]   ;;  %s1289_s4 = inlined_call_operand.vmem [shape: f32[2,8,32], index: 4, kind: output, shape index: {}]  }
   0x1 LB: > { %s1030_s16 = sadd.s32 4294967295, %s1148_s15   ;;  %p1034_p0 = scmp.ge.s32.totalorder %s1148_s15, 1  ;;  %s1148_s15 = sphi %s1184_s15, %s14_s15  }
   0x2   : > { %p187_p1 = scmp.lt.s32.totalorder %s1148_s15, 3 }
   0x4   : > { %p188_p2 = pnand %p1034_p0, %p187_p1 }
   0x5   : > { %p222_p3 = scmp.lt.s32.totalorder (!%p188_p2), %s1030_s16, 1  ;;  %v1150_v0 = vmov (!%p188_p2), 0.0   ;;  %vm1151_vm0 = vmmov (!%p188_p2), 0   ;;  %vm260_vm1 = vcmask (!%p188_p2), 64512   ;;  %v247_v3 = vlaneseq (!%p188_p2)  ;;  %s1153_s27 = smov (!%p188_p2), 120  }
   0x6   : > { %191 = sbr.rel (%p188_p2) target bundleno = 1466 (0x5ba), region = 36  ;;  %1069 = vmatprep.subr.mxu0 (!%p188_p2), %v1150_v0  ;;  %1071 = vmatprep.mubr.msk.f32.mxu0 (!%p188_p2), %vm1151_vm0, %v1150_v0  ;;  %v1152_v8 = vmov (!%p188_p2), -1e+09   ;;  %s1154_s28 = smov (!%p188_p2), 112   ;;  %vm938_vm4 = vcmask (!%p188_p2), 130048   ;;  %vm940_vm5 = vcmask (!%p188_p2), 195584  }
   0x7   : > { %1074 = vmatprep.subr.mxu1 (!%p188_p2), %v1150_v0  ;;  %1076 = vmatprep.mubr.msk.f32.mxu1 (!%p188_p2), %vm1151_vm0, %v1150_v0  ;;  %v248_v5 = vshrl.u32 (!%p188_p2), %v247_v3, 7  ;;  %v250_v6 = vand.u32 (!%p188_p2), 127, %v247_v3  ;;  %s1155_s29 = smov (!%p188_p2), 104   ;;  %s1156_s7 = smov (!%p188_p2), 8   ;;  %vm942_vm6 = vcmask (!%p188_p2), 261120  }
   0x8   : > { %s1157_s8 = smov (!%p188_p2), 16   ;;  %s1158_s9 = smov (!%p188_p2), 24  }
   0x9   : > { %v256_v7 = vsub.s32 (!%p188_p2), 0, %v248_v5  ;;  %vm251_vm3 = vcmp.ge.s32.totalorder (!%p188_p2), %v248_v5, %v250_v6 }
   0xa   : > { %v252_v11 = vsel (!%p188_p2), %vm251_vm3, 0.0, %v1152_v8 }
   0xd   : > { %s1291_s16 = smov (!%p222_p3, %s1030_s16), 1 }
   0xe   : > { %s1198_s17 = sshll.u32 %s1291_s16, 3  ;;  %s236_s26 = scalar_lea.vmem %s1288_s3, %s1291_s16 }
   0xf   : > { %s229_s20 = scalar_lea.vmem %s1286_s1, %s1198_s17  ;;  %s225_s23 = scalar_lea.vmem %s1285_s0, %s1198_s17  ;;  %v244_v4 = vld [vmem:[%s236_s26] sm:$0x1] }
  0x10   : > { %v242_v1 = vld [vmem:[%s229_s20] sm:$0xff]  ;;  %vm245_vm2 = vcmp.gt.f32.partialorder %v244_v4, 0.0  ;;  %s233_s6 = scalar_lea.vmem %s1287_s2, %s1198_s17  ;;  %s240_s12 = scalar_lea.vmem %s1289_s4, %s1198_s17 }
  0x11   : > { %1070 = vmatpush3.xpose.msk.msra.mxu0 %vm260_vm1, %v242_v1  ;;  %v241_v2 = vld [vmem:[%s225_s23] sm:$0xff]  ;;  %v246_v9 = vsel %vm245_vm2, 0.0, %v1152_v8  ;;  %425 = vrot.lane.b32.xlu1 %v242_v1, %s1153_s27 }
  0x12   : > { %1084 = vmatprep.subr.mxu0 %v1150_v0  ;;  %v257_v10 = vrot.slane %v246_v9, %v256_v7  ;;  %v1230_v23 = vld [vmem:[%s233_s6] sm:$0xff] }
  0x13   : > { %1075 = vmatpush3.msra.mxu1 %v1230_v23 }
  0x14   : > { %1072 = vmatmul.mubr.msk.f32.vlgmr.msra.gmra.mrb[0].mxu0 %vm260_vm1, %v241_v2  ;;  %v1216_v12 = vadd.f32 %v257_v10, %v252_v11  ;;  %1079 = vmatprep.subr.mxu1 %v1150_v0 }
  0x15   : > { %1086 = vmatprep.mubr.msk.f32.mxu0 %vm1151_vm0, %v1150_v0  ;;  %423 = vrot.lane.b32.xlu1 %v241_v2, %s1153_s27 }
  0x19   : > { %591 = vrot.lane.b32.xlu1 %v241_v2, %s1154_s28 }
  0x1d   : > { %760 = vrot.lane.b32.xlu1 %v242_v1, %s1155_s29 }
  0x21   : > { %758 = vrot.lane.b32.xlu1 %v241_v2, %s1155_s29 }
  0x83   : > { %v426_v24 = vpop.permute.xlu1 %425 }
  0x87   : > { %v424_v26 = vpop.permute.xlu1 %423 }
  0x8b   : > { %v592_v28 = vpop.permute.xlu1 %591 }
  0x8f   : > { %v761_v31 = vpop.permute.xlu1 %760 }
  0x93   : > { %v759_v32 = vpop.permute.xlu1 %758 }
  0xe7   : > { %v333_v13 = vpop.f32.mrb[0].mxu0 }
  0xe8   : > { %v337_v14 = vmul.f32 0.35355338, %v333_v13  ;;  %v1073_v15 = vpop.f32.mrb[1].mxu0 }
  0xea   : > { %v338_v16 = vadd.f32 %v337_v14, %v1216_v12 }
  0xec   : > { %v339_v17 = vsel %vm260_vm1, %v338_v16, -inf }
  0xed   : > { %340 = vmax.xlane.f32.xlu0 %v339_v17 }
 0x17a   : > { %v341_v18 = vpop.xlane.xlu0 %340 }
 0x17b   : > { %v342_v19 = vsub.f32 %v338_v16, %v341_v18 }
 0x17d   : > { %v343_v20 = vmul.f32 1.442695, %v342_v19 }
 0x17f   : > { %1126 = vpow2.f32 %v343_v20 }
 0x189   : > { %v1127_v21 = vpop.eup %1126 }
 0x18a   : > { %v345_v22 = vsel %vm260_vm1, %v1127_v21, 0.0 }
 0x18b   : > { %346 = vadd.xlane.f32.xlu0 %v345_v22 }
 0x1a1   : > { %593 = vrot.lane.b32.xlu0 %v242_v1, %s1154_s28 }
 0x218   : > { %v347_v25 = vpop.xlane.xlu0 %346 }
 0x219   : > { %1128 = vrcp.f32 %v347_v25 }
 0x21c   : > { %v594_v30 = vpop.permute.xlu0 %593 }
 0x223   : > { %v1129_v27 = vpop.eup %1128 }
 0x224   : > { %v349_v29 = vmul.f32 %v1129_v27, %v1127_v21 }
 0x226   : > { %1077 = vmatmul.mubr.msk.f32.vlgmr.msra.gmra.mrb[0].mxu1 %vm260_vm1, %v349_v29 }
 0x227   : > { %1080 = vmatpush3.xpose.msk.msra.mxu1 %vm260_vm1, %v426_v24  ;;  %1081 = vmatprep.mubr.msk.f32.mxu1 %vm1151_vm0, %v1150_v0 }
 0x228   : > { %1089 = vmatprep.subr.mxu1 %v1150_v0 }
 0x22a   : > { %1082 = vmatmul.mubr.msk.f32.vlgmr.msra.gmra.mrb[2].mxu1 %vm260_vm1, %v424_v26 }
 0x22b   : > { %1090 = vmatpush3.xpose.msk.msra.mxu1 %vm260_vm1, %v594_v30  ;;  %1091 = vmatprep.mubr.msk.f32.mxu1 %vm1151_vm0, %v1150_v0 }
 0x22c   : > { %1099 = vmatprep.subr.mxu1 %v1150_v0 }
 0x22e   : > { %1092 = vmatmul.mubr.msk.f32.vlgmr.msra.gmra.mrb[4].mxu1 %vm260_vm1, %v592_v28 }
 0x22f   : > { %1100 = vmatpush3.xpose.msk.msra.mxu1 %vm260_vm1, %v761_v31  ;;  %1101 = vmatprep.mubr.msk.f32.mxu1 %vm1151_vm0, %v1150_v0 }
 0x232   : > { %1102 = vmatmul.mubr.msk.f32.vlgmr.msra.gmra.mrb[6].mxu1 %vm260_vm1, %v759_v32 }
 0x2f9   : > { %v1250_v33 = vpop.f32.mrb[0].mxu1 }
 0x2fa   : > { %v1078_v34 = vpop.f32.mrb[1].mxu1 }
 0x2fd   : > { %v497_v35 = vpop.f32.mrb[2].mxu1 }
 0x2fe   : > { %v501_v36 = vmul.f32 0.35355338, %v497_v35  ;;  %v1083_v37 = vpop.f32.mrb[3].mxu1 }
 0x300   : > { %v502_v38 = vadd.f32 %v501_v36, %v1216_v12 }
 0x301   : > { %v665_v39 = vpop.f32.mrb[4].mxu1 }
 0x302   : > { %v669_v40 = vmul.f32 0.35355338, %v665_v39  ;;  %v503_v41 = vsel %vm260_vm1, %v502_v38, -inf  ;;  %v1093_v42 = vpop.f32.mrb[5].mxu1 }
 0x303   : > { %504 = vmax.xlane.f32.xlu1 %v503_v41 }
 0x304   : > { %v670_v43 = vadd.f32 %v669_v40, %v1216_v12 }
 0x305   : > { %v832_v44 = vpop.f32.mrb[6].mxu1 }
 0x306   : > { %v836_v45 = vmul.f32 0.35355338, %v832_v44  ;;  %v671_v46 = vsel %vm260_vm1, %v670_v43, -inf  ;;  %v1103_v47 = vpop.f32.mrb[7].mxu1 }
 0x307   : > { %672 = vmax.xlane.f32.xlu0 %v671_v46 }
 0x308   : > { %v837_v48 = vadd.f32 %v836_v45, %v1216_v12 }
 0x30a   : > { %v838_v49 = vsel %vm260_vm1, %v837_v48, -inf }
 0x30b   : > { %839 = vmax.xlane.f32.xlu1 %v838_v49 }
 0x390   : > { %v505_v50 = vpop.xlane.xlu1 %504 }
 0x391   : > { %v506_v51 = vsub.f32 %v502_v38, %v505_v50 }
 0x393   : > { %v507_v52 = vmul.f32 1.442695, %v506_v51 }
 0x394   : > { %v673_v53 = vpop.xlane.xlu0 %672 }
 0x395   : > { %1130 = vpow2.f32 %v507_v52  ;;  %v674_v54 = vsub.f32 %v670_v43, %v673_v53 }
 0x397   : > { %v675_v55 = vmul.f32 1.442695, %v674_v54 }
 0x398   : > { %v840_v60 = vpop.xlane.xlu1 %839 }
 0x399   : > { %1132 = vpow2.f32 %v675_v55  ;;  %v841_v61 = vsub.f32 %v837_v48, %v840_v60 }
 0x39b   : > { %v842_v62 = vmul.f32 1.442695, %v841_v61 }
 0x39d   : > { %1134 = vpow2.f32 %v842_v62 }
 0x39f   : > { %v1131_v56 = vpop.eup %1130 }
 0x3a0   : > { %v509_v57 = vsel %vm260_vm1, %v1131_v56, 0.0 }
 0x3a1   : > { %510 = vadd.xlane.f32.xlu1 %v509_v57 }
 0x3a3   : > { %v1133_v58 = vpop.eup %1132 }
 0x3a4   : > { %v677_v59 = vsel %vm260_vm1, %v1133_v58, 0.0 }
 0x3a5   : > { %678 = vadd.xlane.f32.xlu0 %v677_v59 }
 0x3a7   : > { %v1135_v63 = vpop.eup %1134 }
 0x3a8   : > { %v844_v1 = vsel %vm260_vm1, %v1135_v63, 0.0 }
 0x3b2   : > { %682 = vrot.lane.b32.xlu1 %v1230_v23, %s1154_s28 }
 0x3bb   : > { %515 = vrot.lane.b32.xlu0 %v1230_v23, %s1153_s27 }
 0x3d6   : > { %845 = vadd.xlane.f32.xlu1 %v844_v1 }
 0x3e7   : > { %849 = vrot.lane.b32.xlu1 %v1230_v23, %s1155_s29 }
 0x42e   : > { %v511_v2 = vpop.xlane.xlu1 %510 }
 0x42f   : > { %1136 = vrcp.f32 %v511_v2 }
 0x432   : > { %v679_v3 = vpop.xlane.xlu0 %678  ;;  %v683_v7 = vpop.permute.xlu1 %682 }
 0x433   : > { %1138 = vrcp.f32 %v679_v3 }
 0x436   : > { %v516_v4 = vpop.permute.xlu0 %515 }
 0x437   : > { %1085 = vmatpush3.msra.mxu0 %v516_v4 }
 0x438   : > { %1094 = vmatprep.subr.mxu0 %v1150_v0 }
 0x439   : > { %v1137_v5 = vpop.eup %1136 }
 0x43a   : > { %v513_v6 = vmul.f32 %v1137_v5, %v1131_v56 }
 0x43c   : > { %1087 = vmatmul.mubr.msk.f32.vlgmr.msra.gmra.mrb[2].mxu0 %vm260_vm1, %v513_v6 }
 0x43d   : > { %v1139_v8 = vpop.eup %1138  ;;  %1095 = vmatpush3.msra.mxu0 %v683_v7  ;;  %1096 = vmatprep.mubr.msk.f32.mxu0 %vm1151_vm0, %v1150_v0 }
 0x43e   : > { %v681_v9 = vmul.f32 %v1139_v8, %v1133_v58  ;;  %1104 = vmatprep.subr.mxu0 %v1150_v0 }
 0x440   : > { %1097 = vmatmul.mubr.msk.f32.vlgmr.msra.gmra.mrb[4].mxu0 %vm260_vm1, %v681_v9 }
 0x441   : > { %1106 = vmatprep.mubr.msk.f32.mxu0 %vm1151_vm0, %v1150_v0 }
 0x463   : > { %v846_v10 = vpop.xlane.xlu1 %845 }
 0x464   : > { %1140 = vrcp.f32 %v846_v10 }
 0x467   : > { %v850_v11 = vpop.permute.xlu1 %849 }
 0x468   : > { %1105 = vmatpush3.msra.mxu0 %v850_v11 }
 0x46e   : > { %v1141_v12 = vpop.eup %1140 }
 0x46f   : > { %v848_v13 = vmul.f32 %v1141_v12, %v1135_v63 }
 0x471   : > { %1107 = vmatmul.mubr.msk.f32.vlgmr.msra.gmra.mrb[6].mxu0 %vm260_vm1, %v848_v13 }
 0x50f   : > { %v587_v14 = vpop.f32.mrb[2].mxu0 }
 0x510   : > { %926 = vrot.lane.b32.xlu0 %v587_v14, %s1156_s7  ;;  %v1088_v15 = vpop.f32.mrb[3].mxu0 }
 0x513   : > { %v754_v16 = vpop.f32.mrb[4].mxu0 }
 0x514   : > { %930 = vrot.lane.b32.xlu1 %v754_v16, %s1157_s8  ;;  %v1098_v17 = vpop.f32.mrb[5].mxu0 }
 0x544   : > { %v921_v18 = vpop.f32.mrb[6].mxu0 }
 0x545   : > { %934 = vrot.lane.b32.xlu0 %v921_v18, %s1158_s9  ;;  %v1108_v0 = vpop.f32.mrb[7].mxu0 }
 0x582   : > { %v927_v19 = vpop.permute.xlu0 %926 }
 0x583   : > { %v937_v21 = vsel %vm260_vm1, %v1250_v33, %v927_v19 }
 0x586   : > { %v931_v20 = vpop.permute.xlu1 %930 }
 0x587   : > { %v939_v22 = vsel %vm938_vm4, %v937_v21, %v931_v20 }
 0x5b7   : > { %v935_v23 = vpop.permute.xlu0 %934 }
 0x5b8   : > { %v941_v24 = vsel %vm940_vm5, %v939_v22, %v935_v23 }
 0x5b9   : > { %943 = vst.msk [vmem:[%s240_s12] sm:$0xff] %vm942_vm6, %v941_v24 }
 0x5ba PF: > { %s14_s15 = sadd.s32 1, %s1148_s15  }
 0x5bb   : > { %p11_p4 = scmp.ge.s32.totalorder %s14_s15, 4  }
 0x5bd   :  { %13 = sbr.rel (!%p11_p4) target bundleno = 1 (0x1), region = 75 }

</bundles_post_ra>
